<compile_context>
chip_gen: v5e
topology: v5e:2x2
jax: 0.10.0
libtpu: 0.0.40
codegen_flags: <defaults>
</compile_context>

<pallas_src>
import functools

import jax
import jax.numpy as jnp
from jax.experimental import pallas as pl
from jax.experimental.pallas import tpu as pltpu


# ---------------------------------------------------------------------------
# Pallas kernel: one GCN layer  h' = tanh( A_hat @ h @ W + b )
# ---------------------------------------------------------------------------
def gcn_layer_kernel(col_ref,    # scalar-prefetch: [n_i*n_k] int32 dedup col index (SMEM)
                     a_ref,      # [TM, TK]          bf16  A_hat tile (possibly stale)
                     h_ref,      # [TK,H] or [N,H]   bf16  node features (tiled or resident)
                     w_ref,      # [H_pad, H_pad]    bf16  layer weight
                     b_ref,      # [1, H_pad]        f32   layer bias
                     out_ref,    # [TM, H_pad]       bf16  updated node features
                     acc_ref,    # [TM, H_pad]       f32   VMEM accumulator
                     *, tk, h_resident):
    i = pl.program_id(0)
    k = pl.program_id(1)
    nk = pl.num_programs(1)

    @pl.when(k == 0)
    def _init():
        acc_ref[...] = jnp.zeros_like(acc_ref)

    # col_ref[i,k] == k  <=>  block (i,k) of A_hat is (treated as) nonzero.
    # For zero blocks col_ref repeats the previous block index, so the A/h
    # DMAs were elided and the buffers hold stale data -- which is fine
    # because this accumulate is gated off.
    @pl.when(col_ref[i * nk + k] == k)
    def _accumulate():
        if h_resident:
            start = pl.multiple_of(k * tk, tk)
            h_blk = h_ref[pl.ds(start, tk), :]
        else:
            h_blk = h_ref[...]
        acc_ref[...] += jnp.dot(a_ref[...], h_blk,
                                preferred_element_type=jnp.float32)

    @pl.when(k == nk - 1)
    def _finalize():
        ah = acc_ref[...]                                   # f32 [TM, H]
        # (A h) W == A (h W); bf16 cast before the small W matmul is within
        # the 2e-2 tolerance (review-noted; revisit if A/h get quantized).
        hw = jnp.dot(ah.astype(jnp.bfloat16), w_ref[...],
                     preferred_element_type=jnp.float32)
        out_ref[...] = jnp.tanh(hw + b_ref[...]).astype(out_ref.dtype)


def gcn_layer(h, a_bf16, col_idx, w_l, b_l, *, tm, tk, h_resident, vmem_limit):
    n_pad, h_pad = h.shape
    n_i, n_k = n_pad // tm, n_pad // tk

    # Data-dependent (dedup) index maps: zero blocks reuse the previous block
    # index so the auto-pipeliner skips the refetch. Indices are monotone per
    # row block, so the default double-buffering hides the DMA latency.
    a_spec = pl.BlockSpec((tm, tk), lambda i, k, col: (i, col[i * n_k + k]))
    if h_resident:
        h_spec = pl.BlockSpec((n_pad, h_pad), lambda i, k, col: (0, 0))
    else:
        h_spec = pl.BlockSpec((tk, h_pad), lambda i, k, col: (col[i * n_k + k], 0))

    kernel = functools.partial(gcn_layer_kernel, tk=tk, h_resident=h_resident)

    flops = 2 * n_pad * n_pad * h_pad + 2 * n_pad * h_pad * h_pad
    bytes_accessed = (n_pad * n_pad * 2            # A_hat (bf16, upper bound)
                      + 2 * n_pad * h_pad * 2      # h in + h out (bf16)
                      + h_pad * h_pad * 2          # W (bf16)
                      + h_pad * 4)                 # bias (f32)

    grid_spec = pltpu.PrefetchScalarGridSpec(
        num_scalar_prefetch=1,
        grid=(n_i, n_k),
        in_specs=[
            a_spec,                                                # A_hat tile
            h_spec,                                                # h (tiled / resident)
            pl.BlockSpec((h_pad, h_pad), lambda i, k, col: (0, 0)),  # W_l
            pl.BlockSpec((1, h_pad), lambda i, k, col: (0, 0)),      # b_l
        ],
        out_specs=pl.BlockSpec((tm, h_pad), lambda i, k, col: (i, 0)),
        scratch_shapes=[pltpu.VMEM((tm, h_pad), jnp.float32)],
    )

    return pl.pallas_call(
        kernel,
        out_shape=jax.ShapeDtypeStruct((n_pad, h_pad), jnp.bfloat16),
        grid_spec=grid_spec,
        compiler_params=pltpu.CompilerParams(
            dimension_semantics=("parallel", "arbitrary"),
            vmem_limit_bytes=vmem_limit),
        cost_estimate=pl.CostEstimate(
            flops=flops,
            transcendentals=n_pad * h_pad,
            bytes_accessed=bytes_accessed),
    )(col_idx, a_bf16, h, w_l, b_l)


# ---------------------------------------------------------------------------
# Tiling selection + one-time graph preprocessing (hoisted out of forward)
# ---------------------------------------------------------------------------
def _round_up(x, m):
    return (x + m - 1) // m * m


def _largest_tile(limit, candidates):
    for c in candidates:
        if c <= limit:
            return c
    return candidates[-1]


def choose_tiling(n, hidden_dim):
    h_pad = _round_up(hidden_dim, 128)
    n128 = _round_up(n, 128)
    tm = _largest_tile(n128, (512, 256, 128))          # row tile (sublane axis)
    tk = _largest_tile(n128, (1024, 512, 256, 128))    # neighbor tile (lane axis)
    n_pad = _round_up(n, max(tm, tk))

    # Keep h resident in VMEM when it comfortably fits (conservative 8 MiB so
    # even a double-buffered copy stays well inside v7x's per-TC budget).
    h_resident = (n_pad * h_pad * 2) <= (8 << 20)

    a_buf = 2 * tm * tk * 2
    h_buf = (2 * n_pad * h_pad * 2) if h_resident else (2 * tk * h_pad * 2)
    w_buf = 2 * h_pad * h_pad * 2
    o_buf = 2 * tm * h_pad * 2
    acc_buf = tm * h_pad * 4
    est = a_buf + h_buf + w_buf + o_buf + acc_buf + (1 << 20)
    vmem_limit = int(min(48 << 20, max(32 << 20, 2 * est)))   # <=48 MiB: safe on v7x

    return dict(tm=tm, tk=tk, n_pad=n_pad, h_pad=h_pad,
                h_resident=h_resident, vmem_limit=vmem_limit)


def build_gcn_norm_adj(edge_index, num_nodes):
    src, dst = edge_index[0], edge_index[1]
    a = jnp.zeros((num_nodes, num_nodes), jnp.float32)
    a = a.at[dst, src].add(1.0)                              # message src -> dst
    a = a + jnp.eye(num_nodes, dtype=jnp.float32)            # add self loops
    deg = jnp.sum(a, axis=1)
    dinv = jnp.where(deg > 0, 1.0 / jnp.sqrt(deg), 0.0)
    return dinv[:, None] * a * dinv[None, :]                 # D^-1/2 (A+I) D^-1/2


def preprocess_graph(edge_index, num_nodes, tiling):
    """One-time per graph: padded bf16 A_hat + dedup block-column indices."""
    tm, tk, n_pad = tiling["tm"], tiling["tk"], tiling["n_pad"]
    n_i, n_k = n_pad // tm, n_pad // tk

    ahat = build_gcn_norm_adj(edge_index, num_nodes)
    a_bf16 = jnp.zeros((n_pad, n_pad), jnp.bfloat16)
    a_bf16 = a_bf16.at[:num_nodes, :num_nodes].set(ahat.astype(jnp.bfloat16))

    # Block occupancy straight from edge_index (edges + self-loop diagonal);
    # no extra dense O(N^2) pass.
    src, dst = edge_index[0], edge_index[1]
    nodes = jnp.arange(num_nodes)
    bi = jnp.concatenate([dst // tm, nodes // tm])
    bk = jnp.concatenate([src // tk, nodes // tk])
    mask = jnp.zeros((n_i, n_k), jnp.bool_).at[bi, bk].set(True)

    # Dedup column index: zero blocks repeat the last nonzero column so the
    # pipeline sees an unchanged block index and skips the DMA. Rows whose
    # leading blocks are zero clamp to column 0 (fetching a genuinely zero
    # block once; accumulating it is harmless).
    kidx = jnp.broadcast_to(jnp.arange(n_k)[None, :], (n_i, n_k))
    last_nz = jnp.where(mask, kidx, -1)
    col_idx = jnp.maximum(jax.lax.cummax(last_nz, axis=1), 0).astype(jnp.int32)

    return a_bf16, ahat, col_idx.reshape(-1)


# ---------------------------------------------------------------------------
# Forward wrapper: tiny Linears + padding plumbing in XLA, GCN layers in Pallas
# ---------------------------------------------------------------------------
def dgn_forward(x, a_bf16, col_idx, params, *, n, num_layers, tiling):
    tm, tk = tiling["tm"], tiling["tk"]
    n_pad, h_pad = tiling["n_pad"], tiling["h_pad"]
    hdim = params["emb_w"].shape[1]

    # embedding Linear (contraction dim = input_dim, tiny) stays in XLA.
    h0 = x @ params["emb_w"] + params["emb_b"]                  # [N, H] f32
    h = jnp.zeros((n_pad, h_pad), jnp.bfloat16)
    h = h.at[:n, :hdim].set(h0.astype(jnp.bfloat16))

    conv_w = jnp.zeros((num_layers, h_pad, h_pad), jnp.bfloat16)
    conv_w = conv_w.at[:, :hdim, :hdim].set(params["conv_w"].astype(jnp.bfloat16))
    conv_b = jnp.zeros((num_layers, 1, h_pad), jnp.float32)
    conv_b = conv_b.at[:, 0, :hdim].set(params["conv_b"])

    for l in range(num_layers):
        h = gcn_layer(h, a_bf16, col_idx, conv_w[l], conv_b[l],
                      tm=tm, tk=tk,
                      h_resident=tiling["h_resident"],
                      vmem_limit=tiling["vmem_limit"])

    # readout Linear (output dim tiny) stays in XLA.
    h_f32 = h[:n, :hdim].astype(jnp.float32)
    return h_f32 @ params["ro_w"] + params["ro_b"]


# ---------------------------------------------------------------------------
# Params + pure-JAX reference
# ---------------------------------------------------------------------------
def init_params(key, input_dim, hidden_dim, output_dim, num_layers):
    ks = jax.random.split(key, 6)
    scale = 0.1
    return {
        "emb_w": scale * jax.random.normal(ks[0], (input_dim, hidden_dim), jnp.float32),
        "emb_b": scale * jax.random.normal(ks[1], (1, hidden_dim), jnp.float32),
        "conv_w": scale * jax.random.normal(ks[2], (num_layers, hidden_dim, hidden_dim), jnp.float32),
        "conv_b": scale * jax.random.normal(ks[3], (num_layers, hidden_dim), jnp.float32),
        "ro_w": scale * jax.random.normal(ks[4], (hidden_dim, output_dim), jnp.float32),
        "ro_b": scale * jax.random.normal(ks[5], (1, output_dim), jnp.float32),
    }


def dgn_ref(x, ahat, params, num_layers):
    h = x @ params["emb_w"] + params["emb_b"]
    for l in range(num_layers):
        h = jnp.tanh(ahat @ (h @ params["conv_w"][l]) + params["conv_b"][l][None, :])
    return h @ params["ro_w"] + params["ro_b"]


if __name__ == "__main__":
    # Small deterministic synthetic graph: two rings (150 + 100 nodes) plus 50
    # isolated nodes, so with 256-wide tiles the off-diagonal A_hat blocks are
    # all-zero -- exercising the DMA-skipping dedup path.
    N = 300
    INPUT_DIM = 4
    HIDDEN_DIM = 32
    OUTPUT_DIM = 4
    NUM_LAYERS = 2

    key = jax.random.PRNGKey(0)
    kx, kp = jax.random.split(key)
    x = jax.random.normal(kx, (N, INPUT_DIM), jnp.float32)

    def ring(start, count):
        idx = jnp.arange(count) + start
        nxt = (jnp.arange(count) + 1) % count + start
        return jnp.concatenate([idx, nxt]), jnp.concatenate([nxt, idx])

    s1, d1 = ring(0, 150)
    s2, d2 = ring(150, 100)
    edge_index = jnp.stack([jnp.concatenate([s1, s2]),
                            jnp.concatenate([d1, d2])])      # [2, E]

    tiling = choose_tiling(N, HIDDEN_DIM)
    a_bf16, ahat, col_idx = preprocess_graph(edge_index, N, tiling)   # once per graph
    params = init_params(kp, INPUT_DIM, HIDDEN_DIM, OUTPUT_DIM, NUM_LAYERS)

    fwd = jax.jit(functools.partial(dgn_forward, n=N, num_layers=NUM_LAYERS,
                                    tiling=tiling))
    out = jax.block_until_ready(fwd(x, a_bf16, col_idx, params))

    ref = dgn_ref(x, ahat, params, NUM_LAYERS)
    assert out.shape == (N, OUTPUT_DIM)
    err = float(jnp.max(jnp.abs(out - ref)))
    assert err < 2e-2, f"max abs err {err}"

    print("KERNEL_OK")
</pallas_src>

<mosaic_0001>
module attributes {stable_mosaic.version = 11 : i64} {
  func.func @gcn_layer_kernel(%arg0: i32, %arg1: i32, %arg2: memref<4xi32, #tpu.memory_space<smem>>, %arg3: memref<256x256xbf16, #tpu.memory_space<vmem>>, %arg4: memref<512x128xbf16, #tpu.memory_space<vmem>>, %arg5: memref<128x128xbf16, #tpu.memory_space<vmem>>, %arg6: memref<1x128xf32, #tpu.memory_space<vmem>>, %arg7: memref<256x128xbf16, #tpu.memory_space<vmem>>, %arg8: memref<256x128xf32, #tpu.memory_space<vmem>>) attributes {dimension_semantics = [#tpu.dimension_semantics<parallel>, #tpu.dimension_semantics<arbitrary>], iteration_bounds = array<i64: 2, 2>, scalar_prefetch = 1 : i64, scratch_operands = 1 : i64, tpu.core_type = #tpu.core_type<tc>, window_params = [{transform_indices = @transform_0, window_bounds = array<i64: 256, 256>}, {pipeline_mode = #tpu.pipeline_mode<synchronous>, transform_indices = @transform_1, window_bounds = array<i64: 512, 128>}, {pipeline_mode = #tpu.pipeline_mode<synchronous>, transform_indices = @transform_2, window_bounds = array<i64: 128, 128>}, {pipeline_mode = #tpu.pipeline_mode<synchronous>, transform_indices = @transform_3, window_bounds = array<i64: 1, 128>}, {transform_indices = @transform_4, window_bounds = array<i64: 256, 128>}]} {
    %c0_i32 = arith.constant 0 : i32
    %0 = arith.cmpi eq, %arg1, %c0_i32 : i32
    %1 = arith.extui %0 : i1 to i32
    %c0_i32_0 = arith.constant 0 : i32
    %2 = arith.cmpi ne, %1, %c0_i32_0 : i32
    scf.if %2 {
      %cst = arith.constant 0.000000e+00 : f32
      %13 = vector.broadcast %cst : f32 to vector<256x128xf32>
      %c0 = arith.constant 0 : index
      %c0_3 = arith.constant 0 : index
      %14 = vector.load %arg8[%c0, %c0_3] : memref<256x128xf32, #tpu.memory_space<vmem>>, vector<256x128xf32>
      tpu.vector_store %arg8[%c0, %c0_3], %13 {strides = array<i32>} : memref<256x128xf32, #tpu.memory_space<vmem>>, vector<256x128xf32>,
    } else {
    }
    %c2_i32 = arith.constant 2 : i32
    %3 = arith.muli %arg0, %c2_i32 : i32
    %4 = arith.addi %3, %arg1 : i32
    %5 = arith.index_cast %4 : i32 to index
    %6 = memref.load %arg2[%5] : memref<4xi32, #tpu.memory_space<smem>>
    %7 = arith.cmpi eq, %6, %arg1 : i32
    %8 = arith.extui %7 : i1 to i32
    %c0_i32_1 = arith.constant 0 : i32
    %9 = arith.cmpi ne, %8, %c0_i32_1 : i32
    scf.if %9 {
      %c256_i32 = arith.constant 256 : i32
      %13 = arith.muli %arg1, %c256_i32 : i32
      %14 = tpu.assume_multiple %13, 256 : i32
      %15 = arith.index_cast %14 : i32 to index
      %c0 = arith.constant 0 : index
      %16 = vector.load %arg4[%15, %c0] : memref<512x128xbf16, #tpu.memory_space<vmem>>, vector<256x128xbf16>
      %c0_3 = arith.constant 0 : index
      %c0_4 = arith.constant 0 : index
      %17 = vector.load %arg8[%c0_3, %c0_4] : memref<256x128xf32, #tpu.memory_space<vmem>>, vector<256x128xf32>
      %c0_5 = arith.constant 0 : index
      %c0_6 = arith.constant 0 : index
      %18 = vector.load %arg3[%c0_5, %c0_6] : memref<256x256xbf16, #tpu.memory_space<vmem>>, vector<256x256xbf16>
      %cst = arith.constant dense<0.000000e+00> : vector<256x128xf32>
      %19 = tpu.matmul %18, %16, %cst {dimension_numbers = #tpu.dot_dimension_numbers<[1], [0], [0], [1], [0, 0, 1, 1], [], []>} : vector<256x256xbf16>, vector<256x128xbf16>, vector<256x128xf32> -> vector<256x128xf32>
      %20 = arith.addf %17, %19 : vector<256x128xf32>
      %c0_7 = arith.constant 0 : index
      %c0_8 = arith.constant 0 : index
      %21 = vector.load %arg8[%c0_7, %c0_8] : memref<256x128xf32, #tpu.memory_space<vmem>>, vector<256x128xf32>
      tpu.vector_store %arg8[%c0_7, %c0_8], %20 {strides = array<i32>} : memref<256x128xf32, #tpu.memory_space<vmem>>, vector<256x128xf32>,
    } else {
    }
    %c1_i32 = arith.constant 1 : i32
    %10 = arith.cmpi eq, %arg1, %c1_i32 : i32
    %11 = arith.extui %10 : i1 to i32
    %c0_i32_2 = arith.constant 0 : i32
    %12 = arith.cmpi ne, %11, %c0_i32_2 : i32
    scf.if %12 {
      %c0 = arith.constant 0 : index
      %c0_3 = arith.constant 0 : index
      %13 = vector.load %arg8[%c0, %c0_3] : memref<256x128xf32, #tpu.memory_space<vmem>>, vector<256x128xf32>
      %14 = arith.truncf %13 : vector<256x128xf32> to vector<256x128xbf16>
      %c0_4 = arith.constant 0 : index
      %c0_5 = arith.constant 0 : index
      %15 = vector.load %arg5[%c0_4, %c0_5] : memref<128x128xbf16, #tpu.memory_space<vmem>>, vector<128x128xbf16>
      %cst = arith.constant dense<0.000000e+00> : vector<256x128xf32>
      %16 = tpu.matmul %14, %15, %cst {dimension_numbers = #tpu.dot_dimension_numbers<[1], [0], [0], [1], [0, 0, 1, 1], [], []>} : vector<256x128xbf16>, vector<128x128xbf16>, vector<256x128xf32> -> vector<256x128xf32>
      %c0_6 = arith.constant 0 : index
      %c0_7 = arith.constant 0 : index
      %17 = vector.load %arg6[%c0_6, %c0_7] : memref<1x128xf32, #tpu.memory_space<vmem>>, vector<1x128xf32>
      %18 = vector.broadcast %17 : vector<1x128xf32> to vector<256x128xf32>
      %19 = arith.addf %16, %18 : vector<256x128xf32>
      %20 = math.tanh %19 : vector<256x128xf32>
      %21 = arith.truncf %20 : vector<256x128xf32> to vector<256x128xbf16>
      %c0_8 = arith.constant 0 : index
      %c0_9 = arith.constant 0 : index
      %22 = vector.load %arg7[%c0_8, %c0_9] : memref<256x128xbf16, #tpu.memory_space<vmem>>, vector<256x128xbf16>
      tpu.vector_store %arg7[%c0_8, %c0_9], %21 {strides = array<i32>} : memref<256x128xbf16, #tpu.memory_space<vmem>>, vector<256x128xbf16>,
    } else {
    }
    return
  }
  func.func @transform_0(%arg0: i32, %arg1: i32, %arg2: memref<4xi32, #tpu.memory_space<smem>>) -> (i32, i32) {
    %c2_i32 = arith.constant 2 : i32
    %0 = arith.muli %arg0, %c2_i32 : i32
    %1 = arith.addi %0, %arg1 : i32
    %2 = arith.index_cast %1 : i32 to index
    %3 = memref.load %arg2[%2] : memref<4xi32, #tpu.memory_space<smem>>
    %c0_i32 = arith.constant 0 : i32
    return %arg0, %3 : i32, i32
  }
  func.func @transform_1(%arg0: i32, %arg1: i32, %arg2: memref<4xi32, #tpu.memory_space<smem>>) -> (i32, i32) {
    %c0_i32 = arith.constant 0 : i32
    %c0_i32_0 = arith.constant 0 : i32
    %c0_i32_1 = arith.constant 0 : i32
    return %c0_i32, %c0_i32_0 : i32, i32
  }
  func.func @transform_2(%arg0: i32, %arg1: i32, %arg2: memref<4xi32, #tpu.memory_space<smem>>) -> (i32, i32) {
    %c0_i32 = arith.constant 0 : i32
    %c0_i32_0 = arith.constant 0 : i32
    %c0_i32_1 = arith.constant 0 : i32
    return %c0_i32, %c0_i32_0 : i32, i32
  }
  func.func @transform_3(%arg0: i32, %arg1: i32, %arg2: memref<4xi32, #tpu.memory_space<smem>>) -> (i32, i32) {
    %c0_i32 = arith.constant 0 : i32
    %c0_i32_0 = arith.constant 0 : i32
    %c0_i32_1 = arith.constant 0 : i32
    return %c0_i32, %c0_i32_0 : i32, i32
  }
  func.func @transform_4(%arg0: i32, %arg1: i32, %arg2: memref<4xi32, #tpu.memory_space<smem>>) -> (i32, i32) {
    %c0_i32 = arith.constant 0 : i32
    %c0_i32_0 = arith.constant 0 : i32
    return %arg0, %c0_i32 : i32, i32
  }
}

module attributes {stable_mosaic.version = 11 : i64} {
  func.func @gcn_layer_kernel(%arg0: i32, %arg1: i32, %arg2: memref<4xi32, #tpu.memory_space<smem>>, %arg3: memref<256x256xbf16, #tpu.memory_space<vmem>>, %arg4: memref<512x128xbf16, #tpu.memory_space<vmem>>, %arg5: memref<128x128xbf16, #tpu.memory_space<vmem>>, %arg6: memref<1x128xf32, #tpu.memory_space<vmem>>, %arg7: memref<256x128xbf16, #tpu.memory_space<vmem>>, %arg8: memref<256x128xf32, #tpu.memory_space<vmem>>) attributes {dimension_semantics = [#tpu.dimension_semantics<parallel>, #tpu.dimension_semantics<arbitrary>], iteration_bounds = array<i64: 2, 2>, scalar_prefetch = 1 : i64, scratch_operands = 1 : i64, tpu.core_type = #tpu.core_type<tc>, window_params = [{transform_indices = @transform_0, window_bounds = array<i64: 256, 256>}, {pipeline_mode = #tpu.pipeline_mode<synchronous>, transform_indices = @transform_1, window_bounds = array<i64: 512, 128>}, {pipeline_mode = #tpu.pipeline_mode<synchronous>, transform_indices = @transform_2, window_bounds = array<i64: 128, 128>}, {pipeline_mode = #tpu.pipeline_mode<synchronous>, transform_indices = @transform_3, window_bounds = array<i64: 1, 128>}, {transform_indices = @transform_4, window_bounds = array<i64: 256, 128>}]} {
    %c0_i32 = arith.constant 0 : i32
    %0 = arith.cmpi eq, %arg1, %c0_i32 : i32
    %1 = arith.extui %0 : i1 to i32
    %c0_i32_0 = arith.constant 0 : i32
    %2 = arith.cmpi ne, %1, %c0_i32_0 : i32
    scf.if %2 {
      %cst = arith.constant 0.000000e+00 : f32
      %13 = vector.broadcast %cst : f32 to vector<256x128xf32>
      %c0 = arith.constant 0 : index
      %c0_3 = arith.constant 0 : index
      %14 = vector.load %arg8[%c0, %c0_3] : memref<256x128xf32, #tpu.memory_space<vmem>>, vector<256x128xf32>
      tpu.vector_store %arg8[%c0, %c0_3], %13 {strides = array<i32>} : memref<256x128xf32, #tpu.memory_space<vmem>>, vector<256x128xf32>,
    } else {
    }
    %c2_i32 = arith.constant 2 : i32
    %3 = arith.muli %arg0, %c2_i32 : i32
    %4 = arith.addi %3, %arg1 : i32
    %5 = arith.index_cast %4 : i32 to index
    %6 = memref.load %arg2[%5] : memref<4xi32, #tpu.memory_space<smem>>
    %7 = arith.cmpi eq, %6, %arg1 : i32
    %8 = arith.extui %7 : i1 to i32
    %c0_i32_1 = arith.constant 0 : i32
    %9 = arith.cmpi ne, %8, %c0_i32_1 : i32
    scf.if %9 {
      %c256_i32 = arith.constant 256 : i32
      %13 = arith.muli %arg1, %c256_i32 : i32
      %14 = tpu.assume_multiple %13, 256 : i32
      %15 = arith.index_cast %14 : i32 to index
      %c0 = arith.constant 0 : index
      %16 = vector.load %arg4[%15, %c0] : memref<512x128xbf16, #tpu.memory_space<vmem>>, vector<256x128xbf16>
      %c0_3 = arith.constant 0 : index
      %c0_4 = arith.constant 0 : index
      %17 = vector.load %arg8[%c0_3, %c0_4] : memref<256x128xf32, #tpu.memory_space<vmem>>, vector<256x128xf32>
      %c0_5 = arith.constant 0 : index
      %c0_6 = arith.constant 0 : index
      %18 = vector.load %arg3[%c0_5, %c0_6] : memref<256x256xbf16, #tpu.memory_space<vmem>>, vector<256x256xbf16>
      %cst = arith.constant dense<0.000000e+00> : vector<256x128xf32>
      %19 = tpu.matmul %18, %16, %cst {dimension_numbers = #tpu.dot_dimension_numbers<[1], [0], [0], [1], [0, 0, 1, 1], [], []>} : vector<256x256xbf16>, vector<256x128xbf16>, vector<256x128xf32> -> vector<256x128xf32>
      %20 = arith.addf %17, %19 : vector<256x128xf32>
      %c0_7 = arith.constant 0 : index
      %c0_8 = arith.constant 0 : index
      %21 = vector.load %arg8[%c0_7, %c0_8] : memref<256x128xf32, #tpu.memory_space<vmem>>, vector<256x128xf32>
      tpu.vector_store %arg8[%c0_7, %c0_8], %20 {strides = array<i32>} : memref<256x128xf32, #tpu.memory_space<vmem>>, vector<256x128xf32>,
    } else {
    }
    %c1_i32 = arith.constant 1 : i32
    %10 = arith.cmpi eq, %arg1, %c1_i32 : i32
    %11 = arith.extui %10 : i1 to i32
    %c0_i32_2 = arith.constant 0 : i32
    %12 = arith.cmpi ne, %11, %c0_i32_2 : i32
    scf.if %12 {
      %c0 = arith.constant 0 : index
      %c0_3 = arith.constant 0 : index
      %13 = vector.load %arg8[%c0, %c0_3] : memref<256x128xf32, #tpu.memory_space<vmem>>, vector<256x128xf32>
      %14 = arith.truncf %13 : vector<256x128xf32> to vector<256x128xbf16>
      %c0_4 = arith.constant 0 : index
      %c0_5 = arith.constant 0 : index
      %15 = vector.load %arg5[%c0_4, %c0_5] : memref<128x128xbf16, #tpu.memory_space<vmem>>, vector<128x128xbf16>
      %cst = arith.constant dense<0.000000e+00> : vector<256x128xf32>
      %16 = tpu.matmul %14, %15, %cst {dimension_numbers = #tpu.dot_dimension_numbers<[1], [0], [0], [1], [0, 0, 1, 1], [], []>} : vector<256x128xbf16>, vector<128x128xbf16>, vector<256x128xf32> -> vector<256x128xf32>
      %c0_6 = arith.constant 0 : index
      %c0_7 = arith.constant 0 : index
      %17 = vector.load %arg6[%c0_6, %c0_7] : memref<1x128xf32, #tpu.memory_space<vmem>>, vector<1x128xf32>
      %18 = vector.broadcast %17 : vector<1x128xf32> to vector<256x128xf32>
      %19 = arith.addf %16, %18 : vector<256x128xf32>
      %20 = math.tanh %19 : vector<256x128xf32>
      %21 = arith.truncf %20 : vector<256x128xf32> to vector<256x128xbf16>
      %c0_8 = arith.constant 0 : index
      %c0_9 = arith.constant 0 : index
      %22 = vector.load %arg7[%c0_8, %c0_9] : memref<256x128xbf16, #tpu.memory_space<vmem>>, vector<256x128xbf16>
      tpu.vector_store %arg7[%c0_8, %c0_9], %21 {strides = array<i32>} : memref<256x128xbf16, #tpu.memory_space<vmem>>, vector<256x128xbf16>,
    } else {
    }
    return
  }
  func.func @transform_0(%arg0: i32, %arg1: i32, %arg2: memref<4xi32, #tpu.memory_space<smem>>) -> (i32, i32) {
    %c2_i32 = arith.constant 2 : i32
    %0 = arith.muli %arg0, %c2_i32 : i32
    %1 = arith.addi %0, %arg1 : i32
    %2 = arith.index_cast %1 : i32 to index
    %3 = memref.load %arg2[%2] : memref<4xi32, #tpu.memory_space<smem>>
    %c0_i32 = arith.constant 0 : i32
    return %arg0, %3 : i32, i32
  }
  func.func @transform_1(%arg0: i32, %arg1: i32, %arg2: memref<4xi32, #tpu.memory_space<smem>>) -> (i32, i32) {
    %c0_i32 = arith.constant 0 : i32
    %c0_i32_0 = arith.constant 0 : i32
    %c0_i32_1 = arith.constant 0 : i32
    return %c0_i32, %c0_i32_0 : i32, i32
  }
  func.func @transform_2(%arg0: i32, %arg1: i32, %arg2: memref<4xi32, #tpu.memory_space<smem>>) -> (i32, i32) {
    %c0_i32 = arith.constant 0 : i32
    %c0_i32_0 = arith.constant 0 : i32
    %c0_i32_1 = arith.constant 0 : i32
    return %c0_i32, %c0_i32_0 : i32, i32
  }
  func.func @transform_3(%arg0: i32, %arg1: i32, %arg2: memref<4xi32, #tpu.memory_space<smem>>) -> (i32, i32) {
    %c0_i32 = arith.constant 0 : i32
    %c0_i32_0 = arith.constant 0 : i32
    %c0_i32_1 = arith.constant 0 : i32
    return %c0_i32, %c0_i32_0 : i32, i32
  }
  func.func @transform_4(%arg0: i32, %arg1: i32, %arg2: memref<4xi32, #tpu.memory_space<smem>>) -> (i32, i32) {
    %c0_i32 = arith.constant 0 : i32
    %c0_i32_0 = arith.constant 0 : i32
    return %arg0, %c0_i32 : i32, i32
  }
}

</mosaic_0001>

<bundles_post_ra>
// kernel: dgn_forward.3
= control target key start
LH: loop header
LB: loop body
LE: loop exit
PB: predicated region body
PF: predicated region fallthrough
CT: control target
= control target key end

     0   :  { %s2058_s21 = smov [#allocation4]   ;;  %s2422_s0 = inlined_call_operand.vmem [shape: s32[4], index: 0, kind: input, shape index: {}]   ;;  %s2423_s1 = inlined_call_operand.vmem [shape: bf16[512,512], index: 1, kind: input, shape index: {}]   ;;  %s2424_s2 = inlined_call_operand.vmem [shape: bf16[512,128], index: 2, kind: input, shape index: {}]   ;;  %s2425_s3 = inlined_call_operand.vmem [shape: bf16[128,128], index: 3, kind: input, shape index: {}]   ;;  %s2426_s4 = inlined_call_operand.vmem [shape: f32[1,128], index: 4, kind: input, shape index: {}]   ;;  %s2427_s5 = inlined_call_operand.vmem [shape: bf16[512,128], index: 5, kind: output, shape index: {}]  }
   0x1   :  { %s11_s20 = sshll.u32 %s2422_s0, 4  ;;  %s12_s20 = int_to_ptr.vmem [resolvable:$true] %s11_s20 }
   0x2   :  { %14 = dma.vmem_to_smem %s12_s20, 16, %s2058_s21, [#allocation3] }
   0x3   :  { %2028 = dma.done.wait [#allocation3], 16 }
   0x4   :  { %2029 = vsyncadd [#allocation3], 4294967280 }
   0x5   :  { %17 = sfence }
   0x6   :  { %s2093_s22 = smov 0   ;;  %s2095_s23 = smov 0  }
   0x7   :  { %s2097_s24 = smov 0   ;;  %s2099_s25 = smov 0  }
   0x8   :  { %s2101_s26 = smov 0   ;;  %s2103_s27 = smov 0  }
   0x9   :  { %s2105_s28 = smov 0  }
   0xa LB: > { %s32_s0 = sadd.s32 1, %s2048_s26  ;;  %s35_s29 = sadd.s32 1, %s2052_s27  ;;  %s2056_s28 = sphi %s2105_s28, %s23_s28   ;;  %s2052_s27 = sphi %s2103_s27, %s2433_s27   ;;  %s2048_s26 = sphi %s2101_s26, %s2432_s26   ;;  %s2044_s25 = sphi %s2099_s25, %s2431_s25   ;;  %s2040_s24 = sphi %s2097_s24, %s2430_s24   ;;  %s2036_s23 = sphi %s2095_s23, %s2429_s23   ;;  %s2032_s22 = sphi %s2093_s22, %s2428_s22  }
   0xb   : > { %p33_p0 = scmp.ge.s32.totalorder %s32_s0, 2  ;;  %s1427_s30 = sshll.u32 %s2052_s27, 1 }
   0xc   : > { %s40_s6 = sadd.s32 %s2048_s26, %s1427_s30  ;;  %p57_p1 = scmp.ne.s32.totalorder %s2036_s23, %s2032_s22 }
   0xd   : > { %s2435_s29 = smov (!%p33_p0, %s35_s29), %s2052_s27  ;;  %p58_p3 = scmp.eq.s32.totalorder %s2056_s28, 0 }
   0xe   : > { %p37_p2 = scmp.ge.s32.totalorder %s2435_s29, 2  ;;  %s2437_s0 = smov (%p33_p0, %s32_s0), 0 }
   0xf   : > { %p59_p4 = por %p58_p3, %p57_p1  ;;  %s41_s7 = sld [smem:[#allocation4 + %s40_s6]] }
  0x10   : > { %s2439_s29 = smov (%p37_p2, %s2435_s29), 0  ;;  %s50_s14 = sadd.s32 1, %s2036_s23 }
  0x11   : > { %s1428_s8 = sshll.u32 %s2439_s29, 1  ;;  %s45_s11 = ssub.s32 %s2052_s27, %s2439_s29 }
  0x12   : > { %s43_s9 = sadd.s32 %s1428_s8, %s2437_s0  ;;  %p1430_p6 = scmp.ge.s32.totalorder %s2056_s28, 4 }
  0x13   : > { %s44_s10 = sld [smem:[#allocation4 + %s43_s9]] }
  0x19   : > { %s46_s12 = ssub.s32 %s41_s7, %s44_s10  ;;  %181 = sbr.rel (%p1430_p6) target bundleno = 73 (0x49), region = 28 }
  0x1a   : > { %s47_s13 = sor.u32 %s46_s12, %s45_s11 }
  0x1b   : > { %p48_p5 = scmp.eq.s32.totalorder %s47_s13, 0 }
  0x1d   : > { %s2146_s15 = scalar_select %p48_p5, %s2036_s23, %s50_s14  }
  0x1e   : > { %184 = sbr.rel (!%p59_p4) target bundleno = 73 (0x49), region = 32  ;;  %s191_s16 = sld [smem:[#allocation4 + %s40_s6]] (%p59_p4) }
  0x1f   : > { %s186_s17 = sand.u32 (%p59_p4), 1, %s2036_s23   ;;  %s1673_s18 = sshll.u32 (%p59_p4), %s2052_s27, 7 }
  0x20   : > { %s1431_s19 = sshll.u32 (%p59_p4), %s186_s17, 8 }
  0x21   : > { %s2159_s6 = scalar_lea.vmem (%p59_p4), [#allocation5], %s1431_s19 }
  0x24   : > { %s1434_s20 = sshll.u32 %s191_s16, 1 }
  0x25   : > { %s195_s21 = sadd.s32 %s1673_s18, %s1434_s20 }
  0x26   : > { %s1436_s30 = sshll.u32 %s195_s21, 2 }
  0x27   : > { %s2154_s9 = scalar_lea.vmem %s2423_s1, %s1436_s30 }
  0x28   : > { %v288_v0 = vld [vmem:[%s2154_s9] sm:$0xff]  ;;  %v290_v1 = vld [vmem:[%s2154_s9 + $0x10] sm:$0xff] }
  0x29   : > { %v292_v2 = vld [vmem:[%s2154_s9 + $0x20] sm:$0xff]  ;;  %289 = vst [vmem:[%s2159_s6] sm:$0xff] %v288_v0  ;;  %v294_v3 = vld [vmem:[%s2154_s9 + $0x30] sm:$0xff] }
  0x2a   : > { %291 = vst [vmem:[%s2159_s6 + $0x8] sm:$0xff] %v290_v1  ;;  %v296_v4 = vld [vmem:[%s2154_s9 + $0x40] sm:$0xff]  ;;  %v298_v5 = vld [vmem:[%s2154_s9 + $0x50] sm:$0xff] }
  0x2b   : > { %293 = vst [vmem:[%s2159_s6 + $0x10] sm:$0xff] %v292_v2  ;;  %v300_v6 = vld [vmem:[%s2154_s9 + $0x60] sm:$0xff]  ;;  %v302_v7 = vld [vmem:[%s2154_s9 + $0x70] sm:$0xff] }
  0x2c   : > { %295 = vst [vmem:[%s2159_s6 + $0x18] sm:$0xff] %v294_v3  ;;  %v304_v8 = vld [vmem:[%s2154_s9 + $0x80] sm:$0xff]  ;;  %v306_v9 = vld [vmem:[%s2154_s9 + $0x90] sm:$0xff] }
  0x2d   : > { %297 = vst [vmem:[%s2159_s6 + $0x20] sm:$0xff] %v296_v4  ;;  %v308_v10 = vld [vmem:[%s2154_s9 + $0xa0] sm:$0xff]  ;;  %v310_v11 = vld [vmem:[%s2154_s9 + $0xb0] sm:$0xff] }
  0x2e   : > { %299 = vst [vmem:[%s2159_s6 + $0x28] sm:$0xff] %v298_v5  ;;  %v312_v12 = vld [vmem:[%s2154_s9 + $0xc0] sm:$0xff]  ;;  %v314_v13 = vld [vmem:[%s2154_s9 + $0xd0] sm:$0xff] }
  0x2f   : > { %301 = vst [vmem:[%s2159_s6 + $0x30] sm:$0xff] %v300_v6  ;;  %v316_v14 = vld [vmem:[%s2154_s9 + $0xe0] sm:$0xff]  ;;  %v318_v15 = vld [vmem:[%s2154_s9 + $0xf0] sm:$0xff] }
  0x30   : > { %303 = vst [vmem:[%s2159_s6 + $0x38] sm:$0xff] %v302_v7  ;;  %v320_v16 = vld [vmem:[%s2154_s9 + $0x100] sm:$0xff]  ;;  %v322_v17 = vld [vmem:[%s2154_s9 + $0x110] sm:$0xff] }
  0x31   : > { %305 = vst [vmem:[%s2159_s6 + $0x40] sm:$0xff] %v304_v8  ;;  %v324_v18 = vld [vmem:[%s2154_s9 + $0x120] sm:$0xff]  ;;  %v326_v19 = vld [vmem:[%s2154_s9 + $0x130] sm:$0xff] }
  0x32   : > { %307 = vst [vmem:[%s2159_s6 + $0x48] sm:$0xff] %v306_v9  ;;  %v328_v20 = vld [vmem:[%s2154_s9 + $0x140] sm:$0xff]  ;;  %v330_v21 = vld [vmem:[%s2154_s9 + $0x150] sm:$0xff] }
  0x33   : > { %309 = vst [vmem:[%s2159_s6 + $0x50] sm:$0xff] %v308_v10  ;;  %v332_v22 = vld [vmem:[%s2154_s9 + $0x160] sm:$0xff]  ;;  %v334_v23 = vld [vmem:[%s2154_s9 + $0x170] sm:$0xff] }
  0x34   : > { %311 = vst [vmem:[%s2159_s6 + $0x58] sm:$0xff] %v310_v11  ;;  %v336_v24 = vld [vmem:[%s2154_s9 + $0x180] sm:$0xff]  ;;  %v338_v25 = vld [vmem:[%s2154_s9 + $0x190] sm:$0xff] }
  0x35   : > { %313 = vst [vmem:[%s2159_s6 + $0x60] sm:$0xff] %v312_v12  ;;  %v340_v26 = vld [vmem:[%s2154_s9 + $0x1a0] sm:$0xff]  ;;  %v342_v27 = vld [vmem:[%s2154_s9 + $0x1b0] sm:$0xff] }
  0x36   : > { %315 = vst [vmem:[%s2159_s6 + $0x68] sm:$0xff] %v314_v13  ;;  %v344_v28 = vld [vmem:[%s2154_s9 + $0x1c0] sm:$0xff]  ;;  %v346_v29 = vld [vmem:[%s2154_s9 + $0x1d0] sm:$0xff] }
  0x37   : > { %317 = vst [vmem:[%s2159_s6 + $0x70] sm:$0xff] %v316_v14  ;;  %v348_v30 = vld [vmem:[%s2154_s9 + $0x1e0] sm:$0xff]  ;;  %v350_v31 = vld [vmem:[%s2154_s9 + $0x1f0] sm:$0xff] }
  0x38   : > { %319 = vst [vmem:[%s2159_s6 + $0x78] sm:$0xff] %v318_v15 }
  0x39   : > { %321 = vst [vmem:[%s2159_s6 + $0x80] sm:$0xff] %v320_v16 }
  0x3a   : > { %323 = vst [vmem:[%s2159_s6 + $0x88] sm:$0xff] %v322_v17 }
  0x3b   : > { %325 = vst [vmem:[%s2159_s6 + $0x90] sm:$0xff] %v324_v18 }
  0x3c   : > { %327 = vst [vmem:[%s2159_s6 + $0x98] sm:$0xff] %v326_v19 }
  0x3d   : > { %329 = vst [vmem:[%s2159_s6 + $0xa0] sm:$0xff] %v328_v20 }
  0x3e   : > { %331 = vst [vmem:[%s2159_s6 + $0xa8] sm:$0xff] %v330_v21 }
  0x3f   : > { %333 = vst [vmem:[%s2159_s6 + $0xb0] sm:$0xff] %v332_v22 }
  0x40   : > { %335 = vst [vmem:[%s2159_s6 + $0xb8] sm:$0xff] %v334_v23 }
  0x41   : > { %337 = vst [vmem:[%s2159_s6 + $0xc0] sm:$0xff] %v336_v24 }
  0x42   : > { %339 = vst [vmem:[%s2159_s6 + $0xc8] sm:$0xff] %v338_v25 }
  0x43   : > { %341 = vst [vmem:[%s2159_s6 + $0xd0] sm:$0xff] %v340_v26 }
  0x44   : > { %343 = vst [vmem:[%s2159_s6 + $0xd8] sm:$0xff] %v342_v27 }
  0x45   : > { %345 = vst [vmem:[%s2159_s6 + $0xe0] sm:$0xff] %v344_v28 }
  0x46   : > { %347 = vst [vmem:[%s2159_s6 + $0xe8] sm:$0xff] %v346_v29 }
  0x47   : > { %349 = vst [vmem:[%s2159_s6 + $0xf0] sm:$0xff] %v348_v30 }
  0x48   : > { %351 = vst [vmem:[%s2159_s6 + $0xf8] sm:$0xff] %v350_v31 }
  0x49 PF: > { %p1437_p7 = scmp.ge.s32.totalorder %s2056_s28, 1  ;;  %p356_p8 = scmp.lt.s32.totalorder %s2056_s28, 5 }
  0x4b   : > { %p357_p9 = pnand %p1437_p7, %p356_p8 }
  0x4c   : > { %s363_s10 = sand.u32 (!%p357_p9), 1, %s2032_s22   ;;  %s1439_s11 = sshll.u32 (!%p357_p9), %s2044_s25, 5 }
  0x4d   : > { %360 = sbr.rel (%p357_p9) target bundleno = 666 (0x29a), region = 70  ;;  %s1438_s12 = sshll.u32 (!%p357_p9), %s363_s10, 8 }
  0x4e   : > { %p394_p10 = scmp.lt.s32.totalorder (!%p357_p9), %s1439_s11, 63  ;;  %s2231_s18 = scalar_lea.vmem (!%p357_p9), [#allocation5], %s1438_s12 }
  0x4f   : > { %p1441_p11 = scmp.ne.s32.totalorder (!%p357_p9), %s2040_s24, 0 }
  0x52   : > { %s2441_s11 = smov (!%p394_p10, %s1439_s11), 63  ;;  %402 = sbr.rel (%p1441_p11) target bundleno = 120 (0x78), region = 78 }
  0x53   : > { %s1440_s13 = sshll.u32 %s2441_s11, 2 }
  0x54   : > { %s2229_s17 = scalar_lea.vmem %s2427_s5, %s1440_s13 }
  0x57   : > { %v2059_v32 = vmov 0.0  }
  0x58   : > { %403 = vst [vmem:[#allocation2 + $0xb0] sm:$0xff] %v2059_v32 }
  0x59   : > { %404 = vst [vmem:[#allocation2] sm:$0xff] %v2059_v32 }
  0x5a   : > { %405 = vst [vmem:[#allocation2 + $0xd8] sm:$0xff] %v2059_v32 }
  0x5b   : > { %406 = vst [vmem:[#allocation2 + $0x18] sm:$0xff] %v2059_v32 }
  0x5c   : > { %407 = vst [vmem:[#allocation2 + $0x50] sm:$0xff] %v2059_v32 }
  0x5d   : > { %408 = vst [vmem:[#allocation2 + $0x68] sm:$0xff] %v2059_v32 }
  0x5e   : > { %409 = vst [vmem:[#allocation2 + $0x30] sm:$0xff] %v2059_v32 }
  0x5f   : > { %410 = vst [vmem:[#allocation2 + $0x48] sm:$0xff] %v2059_v32 }
  0x60   : > { %411 = vst [vmem:[#allocation2 + $0x80] sm:$0xff] %v2059_v32 }
  0x61   : > { %412 = vst [vmem:[#allocation2 + $0x88] sm:$0xff] %v2059_v32 }
  0x62   : > { %413 = vst [vmem:[#allocation2 + $0xe8] sm:$0xff] %v2059_v32 }
  0x63   : > { %414 = vst [vmem:[#allocation2 + $0xb8] sm:$0xff] %v2059_v32 }
  0x64   : > { %415 = vst [vmem:[#allocation2 + $0x60] sm:$0xff] %v2059_v32 }
  0x65   : > { %416 = vst [vmem:[#allocation2 + $0xf0] sm:$0xff] %v2059_v32 }
  0x66   : > { %417 = vst [vmem:[#allocation2 + $0x8] sm:$0xff] %v2059_v32 }
  0x67   : > { %418 = vst [vmem:[#allocation2 + $0x78] sm:$0xff] %v2059_v32 }
  0x68   : > { %419 = vst [vmem:[#allocation2 + $0x38] sm:$0xff] %v2059_v32 }
  0x69   : > { %420 = vst [vmem:[#allocation2 + $0x58] sm:$0xff] %v2059_v32 }
  0x6a   : > { %421 = vst [vmem:[#allocation2 + $0x40] sm:$0xff] %v2059_v32 }
  0x6b   : > { %422 = vst [vmem:[#allocation2 + $0xc8] sm:$0xff] %v2059_v32 }
  0x6c   : > { %423 = vst [vmem:[#allocation2 + $0xe0] sm:$0xff] %v2059_v32 }
  0x6d   : > { %424 = vst [vmem:[#allocation2 + $0x90] sm:$0xff] %v2059_v32 }
  0x6e   : > { %425 = vst [vmem:[#allocation2 + $0x70] sm:$0xff] %v2059_v32 }
  0x6f   : > { %426 = vst [vmem:[#allocation2 + $0xc0] sm:$0xff] %v2059_v32 }
  0x70   : > { %427 = vst [vmem:[#allocation2 + $0xa8] sm:$0xff] %v2059_v32 }
  0x71   : > { %428 = vst [vmem:[#allocation2 + $0xd0] sm:$0xff] %v2059_v32 }
  0x72   : > { %429 = vst [vmem:[#allocation2 + $0x10] sm:$0xff] %v2059_v32 }
  0x73   : > { %430 = vst [vmem:[#allocation2 + $0x28] sm:$0xff] %v2059_v32 }
  0x74   : > { %431 = vst [vmem:[#allocation2 + $0xa0] sm:$0xff] %v2059_v32 }
  0x75   : > { %432 = vst [vmem:[#allocation2 + $0xf8] sm:$0xff] %v2059_v32 }
  0x76   : > { %433 = vst [vmem:[#allocation2 + $0x20] sm:$0xff] %v2059_v32 }
  0x77   : > { %434 = vst [vmem:[#allocation2 + $0x98] sm:$0xff] %v2059_v32 }
  0x78 PF: > { %s1442_s22 = sshll.u32 %s2044_s25, 1 }
  0x79   : > { %s436_s19 = sadd.s32 %s2040_s24, %s1442_s22 }
  0x7a   : > { %s437_s20 = sld [smem:[#allocation4 + %s436_s19]] }
  0x80   : > { %p1443_p12 = scmp.ne.s32.totalorder %s437_s20, %s2040_s24 }
  0x81   : > { %s1444_s21 = sshll.u32 (!%p1443_p12), %s2040_s24, 8 }
  0x82   : > { %441 = sbr.rel (%p1443_p12) target bundleno = 425 (0x1a9), region = 82  ;;  %s443_s30 = sshra.s32 (!%p1443_p12), %s1444_s21, 3 }
  0x83   : > { %s1445_s8 = sshll.u32 (!%p1443_p12), %s443_s30, 2 }
  0x84   : > { %s2241_s6 = scalar_lea.vmem (!%p1443_p12), %s2424_s2, %s1445_s8 }
  0x87   : > { %v1681_v33 = vld [vmem:[%s2241_s6 + $0x38] sm:$0xff]  ;;  %v1680_v35 = vld [vmem:[%s2241_s6 + $0x30] sm:$0xff]  ;;  %v1679_v37 = vld [vmem:[%s2241_s6 + $0x28] sm:$0xff] }
  0x88   : > { %v1689_v34 = vld [vmem:[%s2241_s6 + $0x78] sm:$0xff]  ;;  %799 = vmatpush.bf16.msra.mxu0 %v1681_v33  ;;  %1825 = vmatpush.bf16.msra.mxu2 %v1681_v33  ;;  %v1688_v36 = vld [vmem:[%s2241_s6 + $0x70] sm:$0xff]  ;;  %v1687_v38 = vld [vmem:[%s2241_s6 + $0x68] sm:$0xff] }
  0x89   : > { %888 = vmatpush.bf16.msra.mxu1 %v1689_v34  ;;  %1833 = vmatpush.bf16.msra.mxu3 %v1689_v34  ;;  %v1678_v39 = vld [vmem:[%s2241_s6 + $0x20] sm:$0xff]  ;;  %v1677_v41 = vld [vmem:[%s2241_s6 + $0x18] sm:$0xff]  ;;  %v1676_v43 = vld [vmem:[%s2241_s6 + $0x10] sm:$0xff] }
  0x8a   : > { %v1686_v40 = vld [vmem:[%s2241_s6 + $0x60] sm:$0xff]  ;;  %v1685_v42 = vld [vmem:[%s2241_s6 + $0x58] sm:$0xff]  ;;  %v1684_v44 = vld [vmem:[%s2241_s6 + $0x50] sm:$0xff] }
  0x8b   : > { %v1675_v45 = vld [vmem:[%s2241_s6 + $0x8] sm:$0xff]  ;;  %v1448_v47 = vld [vmem:[%s2231_s18] sm:$0xf]  ;;  %v1690_v53 = vld [vmem:[%s2231_s18 + $0x4] sm:$0xf] }
  0x8c   : > { %800 = vmatpush.bf16.msra.mxu0 %v1680_v35  ;;  %1826 = vmatpush.bf16.msra.mxu2 %v1680_v35  ;;  %v1683_v46 = vld [vmem:[%s2241_s6 + $0x48] sm:$0xff]  ;;  %v1674_v48 = vld [vmem:[%s2241_s6] sm:$0xff]  ;;  %v1456_v61 = vld [vmem:[%s2231_s18 + $0x10] sm:$0xf] }
  0x8d   : > { %889 = vmatpush.bf16.msra.mxu1 %v1688_v36  ;;  %1834 = vmatpush.bf16.msra.mxu3 %v1688_v36  ;;  %v1691_v49 = vld [vmem:[%s2231_s18 + $0x4] sm:$0xf0]  ;;  %v1512_v50 = vld [vmem:[%s2231_s18 + $0x80] sm:$0xf]  ;;  %v1450_v54 = vld [vmem:[%s2231_s18 + $0x8] sm:$0xf0] }
  0x8e   : > { %v1682_v51 = vld [vmem:[%s2241_s6 + $0x40] sm:$0xff]  ;;  %v1707_v52 = vld [vmem:[%s2231_s18 + $0x84] sm:$0xf0]  ;;  %v1514_v56 = vld [vmem:[%s2231_s18 + $0x88] sm:$0xf0]  ;;  %v1449_v57 = vor.u32 %v1691_v49, %v1448_v47  ;;  %v1453_v59 = vor.u32 %v1690_v53, %v1450_v54 }
  0x8f   : > { %v1706_v55 = vld [vmem:[%s2231_s18 + $0x84] sm:$0xf]  ;;  %v1513_v58 = vor.u32 %v1707_v52, %v1512_v50  ;;  %v1693_v62 = vld [vmem:[%s2231_s18 + $0x14] sm:$0xf0]  ;;  %v1520_v63 = vld [vmem:[%s2231_s18 + $0x90] sm:$0xf] }
  0x90   : > { %801 = vmatpush.bf16.msra.mxu0 %v1679_v37  ;;  %1827 = vmatpush.bf16.msra.mxu2 %v1679_v37  ;;  %v1517_v60 = vor.u32 %v1706_v55, %v1514_v56  ;;  %v1709_v0 = vld [vmem:[%s2231_s18 + $0x94] sm:$0xf0]  ;;  %v1692_v1 = vld [vmem:[%s2231_s18 + $0x14] sm:$0xf]  ;;  %v1458_v2 = vld [vmem:[%s2231_s18 + $0x18] sm:$0xf0]  ;;  %v1457_v5 = vor.u32 %v1693_v62, %v1456_v61 }
  0x91   : > { %890 = vmatpush.bf16.msra.mxu1 %v1687_v38  ;;  %1835 = vmatpush.bf16.msra.mxu3 %v1687_v38  ;;  %v1708_v3 = vld [vmem:[%s2231_s18 + $0x94] sm:$0xf]  ;;  %v1522_v4 = vld [vmem:[%s2231_s18 + $0x98] sm:$0xf0]  ;;  %v1521_v6 = vor.u32 %v1709_v0, %v1520_v63  ;;  %v1461_v7 = vor.u32 %v1692_v1, %v1458_v2  ;;  %v1464_v9 = vld [vmem:[%s2231_s18 + $0x20] sm:$0xf] }
  0x92   : > { %v1525_v8 = vor.u32 %v1708_v3, %v1522_v4  ;;  %v1695_v10 = vld [vmem:[%s2231_s18 + $0x24] sm:$0xf0]  ;;  %v1528_v11 = vld [vmem:[%s2231_s18 + $0xa0] sm:$0xf]  ;;  %v1694_v13 = vld [vmem:[%s2231_s18 + $0x24] sm:$0xf] }
  0x93   : > { %v1711_v12 = vld [vmem:[%s2231_s18 + $0xa4] sm:$0xf0]  ;;  %v1466_v14 = vld [vmem:[%s2231_s18 + $0x28] sm:$0xf0]  ;;  %v1710_v15 = vld [vmem:[%s2231_s18 + $0xa4] sm:$0xf]  ;;  %v1465_v17 = vor.u32 %v1695_v10, %v1464_v9 }
  0x94   : > { %802 = vmatpush.bf16.msra.mxu0 %v1678_v39  ;;  %1828 = vmatpush.bf16.msra.mxu2 %v1678_v39  ;;  %v1530_v16 = vld [vmem:[%s2231_s18 + $0xa8] sm:$0xf0]  ;;  %v1529_v18 = vor.u32 %v1711_v12, %v1528_v11  ;;  %v1469_v19 = vor.u32 %v1694_v13, %v1466_v14  ;;  %v1472_v21 = vld [vmem:[%s2231_s18 + $0x30] sm:$0xf]  ;;  %v1697_v22 = vld [vmem:[%s2231_s18 + $0x34] sm:$0xf0] }
  0x95   : > { %891 = vmatpush.bf16.msra.mxu1 %v1686_v40  ;;  %1836 = vmatpush.bf16.msra.mxu3 %v1686_v40  ;;  %v1533_v20 = vor.u32 %v1710_v15, %v1530_v16  ;;  %v1536_v23 = vld [vmem:[%s2231_s18 + $0xb0] sm:$0xf]  ;;  %v1713_v24 = vld [vmem:[%s2231_s18 + $0xb4] sm:$0xf0]  ;;  %v1696_v25 = vld [vmem:[%s2231_s18 + $0x34] sm:$0xf]  ;;  %v1473_v29 = vor.u32 %v1697_v22, %v1472_v21 }
  0x96   : > { %v1474_v26 = vld [vmem:[%s2231_s18 + $0x38] sm:$0xf0]  ;;  %v1712_v27 = vld [vmem:[%s2231_s18 + $0xb4] sm:$0xf]  ;;  %v1537_v30 = vor.u32 %v1713_v24, %v1536_v23  ;;  %v1480_v33 = vld [vmem:[%s2231_s18 + $0x40] sm:$0xf] }
  0x97   : > { %v1538_v28 = vld [vmem:[%s2231_s18 + $0xb8] sm:$0xf0]  ;;  %v1477_v31 = vor.u32 %v1696_v25, %v1474_v26  ;;  %v1699_v34 = vld [vmem:[%s2231_s18 + $0x44] sm:$0xf0]  ;;  %v1544_v35 = vld [vmem:[%s2231_s18 + $0xc0] sm:$0xf] }
  0x98   : > { %803 = vmatpush.bf16.msra.mxu0 %v1677_v41  ;;  %1829 = vmatpush.bf16.msra.mxu2 %v1677_v41  ;;  %v1541_v32 = vor.u32 %v1712_v27, %v1538_v28  ;;  %v1715_v36 = vld [vmem:[%s2231_s18 + $0xc4] sm:$0xf0]  ;;  %v1698_v37 = vld [vmem:[%s2231_s18 + $0x44] sm:$0xf]  ;;  %v1482_v38 = vld [vmem:[%s2231_s18 + $0x48] sm:$0xf0]  ;;  %v1481_v41 = vor.u32 %v1699_v34, %v1480_v33 }
  0x99   : > { %892 = vmatpush.bf16.msra.mxu1 %v1685_v42  ;;  %1837 = vmatpush.bf16.msra.mxu3 %v1685_v42  ;;  %v1714_v39 = vld [vmem:[%s2231_s18 + $0xc4] sm:$0xf]  ;;  %v1546_v40 = vld [vmem:[%s2231_s18 + $0xc8] sm:$0xf0]  ;;  %v1545_v42 = vor.u32 %v1715_v36, %v1544_v35  ;;  %v1552_v47 = vld [vmem:[%s2231_s18 + $0xd0] sm:$0xf] }
  0x9a   : > { %v1700_v49 = vld [vmem:[%s2231_s18 + $0x54] sm:$0xf]  ;;  %v1490_v50 = vld [vmem:[%s2231_s18 + $0x58] sm:$0xf0]  ;;  %v1702_v61 = vld [vmem:[%s2231_s18 + $0x64] sm:$0xf] }
  0x9b   : > { %v1554_v52 = vld [vmem:[%s2231_s18 + $0xd8] sm:$0xf0]  ;;  %v1493_v55 = vor.u32 %v1700_v49, %v1490_v50  ;;  %v1498_v62 = vld [vmem:[%s2231_s18 + $0x68] sm:$0xf0]  ;;  %v1718_v63 = vld [vmem:[%s2231_s18 + $0xe4] sm:$0xf] }
  0x9c   : > { %804 = vmatpush.bf16.msra.mxu0 %v1676_v43  ;;  %1830 = vmatpush.bf16.msra.mxu2 %v1676_v43  ;;  %v1485_v43 = vor.u32 %v1698_v37, %v1482_v38  ;;  %v1562_v0 = vld [vmem:[%s2231_s18 + $0xe8] sm:$0xf0]  ;;  %v1501_v3 = vor.u32 %v1702_v61, %v1498_v62  ;;  %v1704_v9 = vld [vmem:[%s2231_s18 + $0x74] sm:$0xf]  ;;  %v1506_v10 = vld [vmem:[%s2231_s18 + $0x78] sm:$0xf0] }
  0x9d   : > { %893 = vmatpush.bf16.msra.mxu1 %v1684_v44  ;;  %1838 = vmatpush.bf16.msra.mxu3 %v1684_v44  ;;  %v1549_v44 = vor.u32 %v1714_v39, %v1546_v40  ;;  %v1565_v4 = vor.u32 %v1718_v63, %v1562_v0  ;;  %v1720_v11 = vld [vmem:[%s2231_s18 + $0xf4] sm:$0xf]  ;;  %v1570_v12 = vld [vmem:[%s2231_s18 + $0xf8] sm:$0xf0]  ;;  %v1509_v15 = vor.u32 %v1704_v9, %v1506_v10  ;;  %v480_v27 = vld [vmem:[#allocation2] sm:$0xff] }
  0x9e   : > { %v1573_v16 = vor.u32 %v1720_v11, %v1570_v12  ;;  %v495_v23 = vld [vmem:[#allocation2 + $0x38] sm:$0xff]  ;;  %v499_v63 = vld [vmem:[#allocation2 + $0xe0] sm:$0xff]  ;;  %v500_v9 = vld [vmem:[#allocation2 + $0x90] sm:$0xff] }
  0x9f   : > { %v496_v33 = vld [vmem:[#allocation2 + $0x58] sm:$0xff] }
  0xa0   : > { %805 = vmatpush.bf16.msra.mxu0 %v1675_v45  ;;  %1831 = vmatpush.bf16.msra.mxu2 %v1675_v45  ;;  %v1488_v45 = vld [vmem:[%s2231_s18 + $0x50] sm:$0xf]  ;;  %v481_v37 = vld [vmem:[#allocation2 + $0xd8] sm:$0xff] }
  0xa1   : > { %894 = vmatpush.bf16.msra.mxu1 %v1683_v46  ;;  %1839 = vmatpush.bf16.msra.mxu3 %v1683_v46  ;;  %v1701_v46 = vld [vmem:[%s2231_s18 + $0x54] sm:$0xf0] }
  0xa2   : > { %v1489_v53 = vor.u32 %v1701_v46, %v1488_v45 }
  0xa4   : > { %806 = vmatpush.bf16.msra.mxu0 %v1674_v48  ;;  %1832 = vmatpush.bf16.msra.mxu2 %v1674_v48  ;;  %v1717_v48 = vld [vmem:[%s2231_s18 + $0xd4] sm:$0xf0] }
  0xa5   : > { %895 = vmatpush.bf16.msra.mxu1 %v1682_v51  ;;  %1840 = vmatpush.bf16.msra.mxu3 %v1682_v51  ;;  %v1716_v51 = vld [vmem:[%s2231_s18 + $0xd4] sm:$0xf]  ;;  %v1553_v54 = vor.u32 %v1717_v48, %v1552_v47  ;;  %v482_v47 = vld [vmem:[#allocation2 + $0x18] sm:$0xff] }
  0xa6   : > { %v1557_v56 = vor.u32 %v1716_v51, %v1554_v52 }
  0xa7   : > { %807 = vmatmul.bf16.vlgmr.msra.gmra.mxu0 %v1449_v57  ;;  %847 = vmatmul.bf16.vlgmr.msra.gmra.mxu2 %v1513_v58  ;;  %v1496_v57 = vld [vmem:[%s2231_s18 + $0x60] sm:$0xf]  ;;  %v1703_v58 = vld [vmem:[%s2231_s18 + $0x64] sm:$0xf0] }
  0xa8   : > { %896 = vmatmul.bf16.vlgmr.msra.gmra.mxu1 %v1453_v59  ;;  %936 = vmatmul.bf16.vlgmr.msra.gmra.mxu3 %v1517_v60  ;;  %v1560_v59 = vld [vmem:[%s2231_s18 + $0xe0] sm:$0xf]  ;;  %v1719_v60 = vld [vmem:[%s2231_s18 + $0xe4] sm:$0xf0]  ;;  %v1497_v1 = vor.u32 %v1703_v58, %v1496_v57  ;;  %v483_v57 = vld [vmem:[#allocation2 + $0x50] sm:$0xff] }
  0xa9   : > { %v1561_v2 = vor.u32 %v1719_v60, %v1560_v59 }
  0xb7   : > { %812 = vmatmul.bf16.gmra.mxu0 %v1457_v5  ;;  %852 = vmatmul.bf16.gmra.mxu2 %v1521_v6  ;;  %v1504_v5 = vld [vmem:[%s2231_s18 + $0x70] sm:$0xf]  ;;  %v1705_v6 = vld [vmem:[%s2231_s18 + $0x74] sm:$0xf0] }
  0xb8   : > { %901 = vmatmul.bf16.gmra.mxu1 %v1461_v7  ;;  %941 = vmatmul.bf16.gmra.mxu3 %v1525_v8  ;;  %v1568_v7 = vld [vmem:[%s2231_s18 + $0xf0] sm:$0xf]  ;;  %v1721_v8 = vld [vmem:[%s2231_s18 + $0xf4] sm:$0xf0]  ;;  %v1505_v13 = vor.u32 %v1705_v6, %v1504_v5 }
  0xb9   : > { %v1569_v14 = vor.u32 %v1721_v8, %v1568_v7 }
  0xc7   : > { %817 = vmatmul.bf16.gmra.mxu0 %v1465_v17  ;;  %857 = vmatmul.bf16.gmra.mxu2 %v1529_v18  ;;  %v479_v18 = vld [vmem:[#allocation2 + $0xb0] sm:$0xff] }
  0xc8   : > { %906 = vmatmul.bf16.gmra.mxu1 %v1469_v19  ;;  %946 = vmatmul.bf16.gmra.mxu3 %v1533_v20 }
  0xd7   : > { %822 = vmatmul.bf16.gmra.mxu0 %v1473_v29  ;;  %862 = vmatmul.bf16.gmra.mxu2 %v1537_v30 }
  0xd8   : > { %911 = vmatmul.bf16.gmra.mxu1 %v1477_v31  ;;  %951 = vmatmul.bf16.gmra.mxu3 %v1541_v32 }
  0xe7   : > { %827 = vmatmul.bf16.gmra.mxu0 %v1481_v41  ;;  %867 = vmatmul.bf16.gmra.mxu2 %v1545_v42 }
  0xe8   : > { %916 = vmatmul.bf16.gmra.mxu1 %v1485_v43  ;;  %956 = vmatmul.bf16.gmra.mxu3 %v1549_v44  ;;  %v497_v43 = vld [vmem:[#allocation2 + $0x40] sm:$0xff] }
  0xf7   : > { %832 = vmatmul.bf16.gmra.mxu0 %v1489_v53  ;;  %872 = vmatmul.bf16.gmra.mxu2 %v1553_v54  ;;  %v498_v53 = vld [vmem:[#allocation2 + $0xc8] sm:$0xff] }
  0xf8   : > { %921 = vmatmul.bf16.gmra.mxu1 %v1493_v55  ;;  %961 = vmatmul.bf16.gmra.mxu3 %v1557_v56 }
 0x107   : > { %837 = vmatmul.bf16.gmra.mxu0 %v1497_v1  ;;  %877 = vmatmul.bf16.gmra.mxu2 %v1561_v2 }
 0x108   : > { %926 = vmatmul.bf16.gmra.mxu1 %v1501_v3  ;;  %966 = vmatmul.bf16.gmra.mxu3 %v1565_v4  ;;  %v484_v3 = vld [vmem:[#allocation2 + $0x68] sm:$0xff] }
 0x117   : > { %842 = vmatmul.bf16.gmra.mxu0 %v1505_v13  ;;  %882 = vmatmul.bf16.gmra.mxu2 %v1569_v14  ;;  %v485_v13 = vld [vmem:[#allocation2 + $0x30] sm:$0xff] }
 0x118   : > { %931 = vmatmul.bf16.gmra.mxu1 %v1509_v15  ;;  %971 = vmatmul.bf16.gmra.mxu3 %v1573_v16 }
 0x124   : > { %v808_v17 = vpop.f32.mrf.mxu0 }
 0x125   : > { %v897_v19 = vpop.f32.mrf.mxu1 }
 0x126   : > { %v898_v20 = vadd.f32 %v897_v19, %v808_v17  ;;  %v501_v19 = vld [vmem:[#allocation2 + $0x70] sm:$0xff] }
 0x128   : > { %v977_v21 = vadd.f32 %v898_v20, %v479_v18 }
 0x12a   : > { %1009 = vst [vmem:[#allocation2 + $0xb0] sm:$0xff] %v977_v21  ;;  %v848_v22 = vpop.f32.mrf.mxu2 }
 0x12b   : > { %v937_v24 = vpop.f32.mrf.mxu3 }
 0x12c   : > { %v938_v25 = vadd.f32 %v937_v24, %v848_v22  ;;  %v810_v26 = vpop.f32.mrf.mxu0 }
 0x12d   : > { %v899_v28 = vpop.f32.mrf.mxu1 }
 0x12e   : > { %v993_v29 = vadd.f32 %v938_v25, %v495_v23  ;;  %v900_v30 = vadd.f32 %v899_v28, %v810_v26  ;;  %v486_v23 = vld [vmem:[#allocation2 + $0x48] sm:$0xff] }
 0x130   : > { %1025 = vst [vmem:[#allocation2 + $0x38] sm:$0xff] %v993_v29  ;;  %v978_v31 = vadd.f32 %v900_v30, %v480_v27  ;;  %v502_v29 = vld [vmem:[#allocation2 + $0xc0] sm:$0xff] }
 0x132   : > { %1010 = vst [vmem:[#allocation2] sm:$0xff] %v978_v31  ;;  %v850_v32 = vpop.f32.mrf.mxu2 }
 0x133   : > { %v939_v34 = vpop.f32.mrf.mxu3 }
 0x134   : > { %v940_v35 = vadd.f32 %v939_v34, %v850_v32  ;;  %v813_v36 = vpop.f32.mrf.mxu0 }
 0x135   : > { %v902_v38 = vpop.f32.mrf.mxu1 }
 0x136   : > { %v994_v39 = vadd.f32 %v940_v35, %v496_v33  ;;  %v903_v40 = vadd.f32 %v902_v38, %v813_v36  ;;  %v487_v33 = vld [vmem:[#allocation2 + $0x80] sm:$0xff] }
 0x138   : > { %1026 = vst [vmem:[#allocation2 + $0x58] sm:$0xff] %v994_v39  ;;  %v979_v41 = vadd.f32 %v903_v40, %v481_v37  ;;  %v503_v39 = vld [vmem:[#allocation2 + $0xa8] sm:$0xff] }
 0x13a   : > { %1011 = vst [vmem:[#allocation2 + $0xd8] sm:$0xff] %v979_v41  ;;  %v853_v42 = vpop.f32.mrf.mxu2 }
 0x13b   : > { %v942_v44 = vpop.f32.mrf.mxu3 }
 0x13c   : > { %v943_v45 = vadd.f32 %v942_v44, %v853_v42  ;;  %v815_v46 = vpop.f32.mrf.mxu0 }
 0x13d   : > { %v904_v48 = vpop.f32.mrf.mxu1 }
 0x13e   : > { %v995_v49 = vadd.f32 %v943_v45, %v497_v43  ;;  %v905_v50 = vadd.f32 %v904_v48, %v815_v46  ;;  %v488_v43 = vld [vmem:[#allocation2 + $0x88] sm:$0xff] }
 0x140   : > { %1027 = vst [vmem:[#allocation2 + $0x40] sm:$0xff] %v995_v49  ;;  %v980_v51 = vadd.f32 %v905_v50, %v482_v47  ;;  %v504_v49 = vld [vmem:[#allocation2 + $0xd0] sm:$0xff] }
 0x142   : > { %1012 = vst [vmem:[#allocation2 + $0x18] sm:$0xff] %v980_v51  ;;  %v855_v52 = vpop.f32.mrf.mxu2 }
 0x143   : > { %v944_v54 = vpop.f32.mrf.mxu3 }
 0x144   : > { %v945_v55 = vadd.f32 %v944_v54, %v855_v52  ;;  %v818_v56 = vpop.f32.mrf.mxu0 }
 0x145   : > { %v907_v58 = vpop.f32.mrf.mxu1 }
 0x146   : > { %v996_v59 = vadd.f32 %v945_v55, %v498_v53  ;;  %v908_v60 = vadd.f32 %v907_v58, %v818_v56  ;;  %v489_v53 = vld [vmem:[#allocation2 + $0xe8] sm:$0xff] }
 0x148   : > { %1028 = vst [vmem:[#allocation2 + $0xc8] sm:$0xff] %v996_v59  ;;  %v981_v61 = vadd.f32 %v908_v60, %v483_v57  ;;  %v505_v59 = vld [vmem:[#allocation2 + $0x10] sm:$0xff] }
 0x14a   : > { %1013 = vst [vmem:[#allocation2 + $0x50] sm:$0xff] %v981_v61  ;;  %v858_v62 = vpop.f32.mrf.mxu2 }
 0x14b   : > { %v947_v0 = vpop.f32.mrf.mxu3 }
 0x14c   : > { %v948_v1 = vadd.f32 %v947_v0, %v858_v62  ;;  %v820_v2 = vpop.f32.mrf.mxu0 }
 0x14d   : > { %v909_v4 = vpop.f32.mrf.mxu1 }
 0x14e   : > { %v997_v5 = vadd.f32 %v948_v1, %v499_v63  ;;  %v910_v6 = vadd.f32 %v909_v4, %v820_v2  ;;  %v490_v63 = vld [vmem:[#allocation2 + $0xb8] sm:$0xff] }
 0x150   : > { %1029 = vst [vmem:[#allocation2 + $0xe0] sm:$0xff] %v997_v5  ;;  %v982_v7 = vadd.f32 %v910_v6, %v484_v3  ;;  %v506_v5 = vld [vmem:[#allocation2 + $0x28] sm:$0xff] }
 0x152   : > { %1014 = vst [vmem:[#allocation2 + $0x68] sm:$0xff] %v982_v7  ;;  %v860_v8 = vpop.f32.mrf.mxu2 }
 0x153   : > { %v949_v10 = vpop.f32.mrf.mxu3 }
 0x154   : > { %v950_v11 = vadd.f32 %v949_v10, %v860_v8  ;;  %v823_v12 = vpop.f32.mrf.mxu0 }
 0x155   : > { %v912_v14 = vpop.f32.mrf.mxu1 }
 0x156   : > { %v998_v15 = vadd.f32 %v950_v11, %v500_v9  ;;  %v913_v16 = vadd.f32 %v912_v14, %v823_v12  ;;  %v491_v9 = vld [vmem:[#allocation2 + $0x60] sm:$0xff] }
 0x158   : > { %1030 = vst [vmem:[#allocation2 + $0x90] sm:$0xff] %v998_v15  ;;  %v983_v17 = vadd.f32 %v913_v16, %v485_v13  ;;  %v507_v15 = vld [vmem:[#allocation2 + $0xa0] sm:$0xff] }
 0x15a   : > { %1015 = vst [vmem:[#allocation2 + $0x30] sm:$0xff] %v983_v17  ;;  %v863_v18 = vpop.f32.mrf.mxu2 }
 0x15b   : > { %v952_v20 = vpop.f32.mrf.mxu3 }
 0x15c   : > { %v953_v21 = vadd.f32 %v952_v20, %v863_v18  ;;  %v825_v22 = vpop.f32.mrf.mxu0 }
 0x15d   : > { %v914_v24 = vpop.f32.mrf.mxu1 }
 0x15e   : > { %v999_v25 = vadd.f32 %v953_v21, %v501_v19  ;;  %v915_v26 = vadd.f32 %v914_v24, %v825_v22  ;;  %v492_v19 = vld [vmem:[#allocation2 + $0xf0] sm:$0xff] }
 0x160   : > { %1031 = vst [vmem:[#allocation2 + $0x70] sm:$0xff] %v999_v25  ;;  %v984_v27 = vadd.f32 %v915_v26, %v486_v23  ;;  %v508_v25 = vld [vmem:[#allocation2 + $0xf8] sm:$0xff] }
 0x162   : > { %1016 = vst [vmem:[#allocation2 + $0x48] sm:$0xff] %v984_v27  ;;  %v865_v28 = vpop.f32.mrf.mxu2 }
 0x163   : > { %v954_v30 = vpop.f32.mrf.mxu3 }
 0x164   : > { %v955_v31 = vadd.f32 %v954_v30, %v865_v28  ;;  %v828_v32 = vpop.f32.mrf.mxu0 }
 0x165   : > { %v917_v34 = vpop.f32.mrf.mxu1 }
 0x166   : > { %v1000_v35 = vadd.f32 %v955_v31, %v502_v29  ;;  %v918_v36 = vadd.f32 %v917_v34, %v828_v32  ;;  %v493_v29 = vld [vmem:[#allocation2 + $0x8] sm:$0xff] }
 0x168   : > { %1032 = vst [vmem:[#allocation2 + $0xc0] sm:$0xff] %v1000_v35  ;;  %v985_v37 = vadd.f32 %v918_v36, %v487_v33  ;;  %v509_v35 = vld [vmem:[#allocation2 + $0x20] sm:$0xff] }
 0x16a   : > { %1017 = vst [vmem:[#allocation2 + $0x80] sm:$0xff] %v985_v37  ;;  %v868_v38 = vpop.f32.mrf.mxu2 }
 0x16b   : > { %v957_v40 = vpop.f32.mrf.mxu3 }
 0x16c   : > { %v958_v41 = vadd.f32 %v957_v40, %v868_v38  ;;  %v830_v42 = vpop.f32.mrf.mxu0 }
 0x16d   : > { %v919_v44 = vpop.f32.mrf.mxu1 }
 0x16e   : > { %v1001_v45 = vadd.f32 %v958_v41, %v503_v39  ;;  %v920_v46 = vadd.f32 %v919_v44, %v830_v42  ;;  %v494_v39 = vld [vmem:[#allocation2 + $0x78] sm:$0xff] }
 0x170   : > { %1033 = vst [vmem:[#allocation2 + $0xa8] sm:$0xff] %v1001_v45  ;;  %v986_v47 = vadd.f32 %v920_v46, %v488_v43  ;;  %v510_v45 = vld [vmem:[#allocation2 + $0x98] sm:$0xff] }
 0x172   : > { %1018 = vst [vmem:[#allocation2 + $0x88] sm:$0xff] %v986_v47  ;;  %v870_v48 = vpop.f32.mrf.mxu2 }
 0x173   : > { %v959_v50 = vpop.f32.mrf.mxu3 }
 0x174   : > { %v960_v51 = vadd.f32 %v959_v50, %v870_v48  ;;  %v833_v52 = vpop.f32.mrf.mxu0 }
 0x175   : > { %v922_v54 = vpop.f32.mrf.mxu1 }
 0x176   : > { %v1002_v55 = vadd.f32 %v960_v51, %v504_v49  ;;  %v923_v56 = vadd.f32 %v922_v54, %v833_v52 }
 0x178   : > { %1034 = vst [vmem:[#allocation2 + $0xd0] sm:$0xff] %v1002_v55  ;;  %v987_v57 = vadd.f32 %v923_v56, %v489_v53 }
 0x17a   : > { %1019 = vst [vmem:[#allocation2 + $0xe8] sm:$0xff] %v987_v57  ;;  %v873_v58 = vpop.f32.mrf.mxu2 }
 0x17b   : > { %v962_v60 = vpop.f32.mrf.mxu3 }
 0x17c   : > { %v963_v61 = vadd.f32 %v962_v60, %v873_v58  ;;  %v835_v62 = vpop.f32.mrf.mxu0 }
 0x17d   : > { %v924_v0 = vpop.f32.mrf.mxu1 }
 0x17e   : > { %v1003_v1 = vadd.f32 %v963_v61, %v505_v59  ;;  %v925_v2 = vadd.f32 %v924_v0, %v835_v62 }
 0x180   : > { %1035 = vst [vmem:[#allocation2 + $0x10] sm:$0xff] %v1003_v1  ;;  %v988_v3 = vadd.f32 %v925_v2, %v490_v63 }
 0x182   : > { %1020 = vst [vmem:[#allocation2 + $0xb8] sm:$0xff] %v988_v3  ;;  %v875_v4 = vpop.f32.mrf.mxu2 }
 0x183   : > { %v964_v6 = vpop.f32.mrf.mxu3 }
 0x184   : > { %v965_v7 = vadd.f32 %v964_v6, %v875_v4  ;;  %v838_v8 = vpop.f32.mrf.mxu0 }
 0x185   : > { %v927_v10 = vpop.f32.mrf.mxu1 }
 0x186   : > { %v1004_v11 = vadd.f32 %v965_v7, %v506_v5  ;;  %v928_v12 = vadd.f32 %v927_v10, %v838_v8 }
 0x188   : > { %1036 = vst [vmem:[#allocation2 + $0x28] sm:$0xff] %v1004_v11  ;;  %v989_v13 = vadd.f32 %v928_v12, %v491_v9 }
 0x18a   : > { %1021 = vst [vmem:[#allocation2 + $0x60] sm:$0xff] %v989_v13  ;;  %v878_v14 = vpop.f32.mrf.mxu2 }
 0x18b   : > { %v967_v16 = vpop.f32.mrf.mxu3 }
 0x18c   : > { %v968_v17 = vadd.f32 %v967_v16, %v878_v14  ;;  %v840_v18 = vpop.f32.mrf.mxu0 }
 0x18d   : > { %v929_v20 = vpop.f32.mrf.mxu1 }
 0x18e   : > { %v1005_v21 = vadd.f32 %v968_v17, %v507_v15  ;;  %v930_v22 = vadd.f32 %v929_v20, %v840_v18 }
 0x190   : > { %1037 = vst [vmem:[#allocation2 + $0xa0] sm:$0xff] %v1005_v21  ;;  %v990_v23 = vadd.f32 %v930_v22, %v492_v19 }
 0x192   : > { %1022 = vst [vmem:[#allocation2 + $0xf0] sm:$0xff] %v990_v23  ;;  %v880_v24 = vpop.f32.mrf.mxu2 }
 0x193   : > { %v969_v26 = vpop.f32.mrf.mxu3 }
 0x194   : > { %v970_v27 = vadd.f32 %v969_v26, %v880_v24  ;;  %v843_v28 = vpop.f32.mrf.mxu0 }
 0x195   : > { %v932_v30 = vpop.f32.mrf.mxu1 }
 0x196   : > { %v1006_v31 = vadd.f32 %v970_v27, %v508_v25  ;;  %v933_v32 = vadd.f32 %v932_v30, %v843_v28 }
 0x198   : > { %1038 = vst [vmem:[#allocation2 + $0xf8] sm:$0xff] %v1006_v31  ;;  %v991_v33 = vadd.f32 %v933_v32, %v493_v29 }
 0x19a   : > { %1023 = vst [vmem:[#allocation2 + $0x8] sm:$0xff] %v991_v33  ;;  %v883_v34 = vpop.f32.mrf.mxu2 }
 0x19b   : > { %v972_v36 = vpop.f32.mrf.mxu3 }
 0x19c   : > { %v973_v37 = vadd.f32 %v972_v36, %v883_v34  ;;  %v845_v38 = vpop.f32.mrf.mxu0 }
 0x19d   : > { %v934_v40 = vpop.f32.mrf.mxu1 }
 0x19e   : > { %v1007_v41 = vadd.f32 %v973_v37, %v509_v35  ;;  %v935_v42 = vadd.f32 %v934_v40, %v845_v38 }
 0x1a0   : > { %1039 = vst [vmem:[#allocation2 + $0x20] sm:$0xff] %v1007_v41  ;;  %v992_v43 = vadd.f32 %v935_v42, %v494_v39 }
 0x1a2   : > { %1024 = vst [vmem:[#allocation2 + $0x78] sm:$0xff] %v992_v43  ;;  %v885_v44 = vpop.f32.mrf.mxu2 }
 0x1a3   : > { %v974_v46 = vpop.f32.mrf.mxu3 }
 0x1a4   : > { %v975_v47 = vadd.f32 %v974_v46, %v885_v44 }
 0x1a6   : > { %v1008_v48 = vadd.f32 %v975_v47, %v510_v45 }
 0x1a8   : > { %1040 = vst [vmem:[#allocation2 + $0x98] sm:$0xff] %v1008_v48 }
 0x1a9 PF: > { %p1638_p13 = scmp.ne.s32.totalorder %s2040_s24, 1 }
 0x1ab   : > { %1044 = sbr.rel (%p1638_p13) target bundleno = 666 (0x29a), region = 86 }
 0x1b0   : > { %v1729_v49 = vld [vmem:[%s2425_s3 + $0x38] sm:$0xff]  ;;  %v1728_v50 = vld [vmem:[%s2425_s3 + $0x30] sm:$0xff]  ;;  %v1727_v51 = vld [vmem:[%s2425_s3 + $0x28] sm:$0xff] }
 0x1b1   : > { %1161 = vmatpush.bf16.msra.mxu0 %v1729_v49  ;;  %1841 = vmatpush.bf16.msra.mxu1 %v1729_v49  ;;  %v1726_v52 = vld [vmem:[%s2425_s3 + $0x20] sm:$0xff]  ;;  %v1725_v53 = vld [vmem:[%s2425_s3 + $0x18] sm:$0xff]  ;;  %v1724_v54 = vld [vmem:[%s2425_s3 + $0x10] sm:$0xff] }
 0x1b2   : > { %1842 = vmatpush.bf16.msra.mxu2 %v1729_v49  ;;  %1843 = vmatpush.bf16.msra.mxu3 %v1729_v49  ;;  %v1723_v55 = vld [vmem:[%s2425_s3 + $0x8] sm:$0xff]  ;;  %v1722_v56 = vld [vmem:[%s2425_s3] sm:$0xff]  ;;  %v1045_v57 = vld [vmem:[#allocation2 + $0xb0] sm:$0xff] }
 0x1b3   : > { %v1046_v58 = vld [vmem:[#allocation2] sm:$0xff]  ;;  %v1054_v60 = vld [vmem:[#allocation2 + $0x88] sm:$0xff]  ;;  %v1061_v61 = vld [vmem:[#allocation2 + $0x38] sm:$0xff] }
 0x1b4   : > { %v1053_v59 = vld [vmem:[#allocation2 + $0x80] sm:$0xff]  ;;  %v1062_v62 = vld [vmem:[#allocation2 + $0x58] sm:$0xff]  ;;  %v1069_v63 = vld [vmem:[#allocation2 + $0xa8] sm:$0xff]  ;;  %v1077_v1 = vpack.c.bf16 %v1046_v58, %v1045_v57 }
 0x1b5   : > { %1162 = vmatpush.bf16.msra.mxu0 %v1728_v50  ;;  %1844 = vmatpush.bf16.msra.mxu1 %v1728_v50  ;;  %v1070_v0 = vld [vmem:[#allocation2 + $0xd0] sm:$0xff]  ;;  %v1081_v2 = vpack.c.bf16 %v1054_v60, %v1053_v59  ;;  %v1085_v3 = vpack.c.bf16 %v1062_v62, %v1061_v61  ;;  %v1047_v5 = vld [vmem:[#allocation2 + $0xd8] sm:$0xff]  ;;  %v1055_v7 = vld [vmem:[#allocation2 + $0xe8] sm:$0xff] }
 0x1b6   : > { %1845 = vmatpush.bf16.msra.mxu2 %v1728_v50  ;;  %1846 = vmatpush.bf16.msra.mxu3 %v1728_v50  ;;  %v1089_v4 = vpack.c.bf16 %v1070_v0, %v1069_v63  ;;  %v1048_v6 = vld [vmem:[#allocation2 + $0x18] sm:$0xff]  ;;  %v1063_v9 = vld [vmem:[#allocation2 + $0x40] sm:$0xff]  ;;  %v1064_v10 = vld [vmem:[#allocation2 + $0xc8] sm:$0xff] }
 0x1b7   : > { %v1056_v8 = vld [vmem:[#allocation2 + $0xb8] sm:$0xff]  ;;  %v1071_v11 = vld [vmem:[#allocation2 + $0x10] sm:$0xff]  ;;  %v1072_v12 = vld [vmem:[#allocation2 + $0x28] sm:$0xff]  ;;  %v1078_v13 = vpack.c.bf16 %v1048_v6, %v1047_v5  ;;  %v1086_v15 = vpack.c.bf16 %v1064_v10, %v1063_v9 }
 0x1b8   : > { %v1082_v14 = vpack.c.bf16 %v1056_v8, %v1055_v7  ;;  %v1090_v16 = vpack.c.bf16 %v1072_v12, %v1071_v11  ;;  %v1049_v17 = vld [vmem:[#allocation2 + $0x50] sm:$0xff]  ;;  %v1050_v18 = vld [vmem:[#allocation2 + $0x68] sm:$0xff]  ;;  %v1057_v19 = vld [vmem:[#allocation2 + $0x60] sm:$0xff] }
 0x1b9   : > { %1163 = vmatpush.bf16.msra.mxu0 %v1727_v51  ;;  %1847 = vmatpush.bf16.msra.mxu1 %v1727_v51  ;;  %v1058_v20 = vld [vmem:[#allocation2 + $0xf0] sm:$0xff]  ;;  %v1065_v21 = vld [vmem:[#allocation2 + $0xe0] sm:$0xff]  ;;  %v1074_v24 = vld [vmem:[#allocation2 + $0xf8] sm:$0xff]  ;;  %v1079_v25 = vpack.c.bf16 %v1050_v18, %v1049_v17 }
 0x1ba   : > { %1848 = vmatpush.bf16.msra.mxu2 %v1727_v51  ;;  %1849 = vmatpush.bf16.msra.mxu3 %v1727_v51  ;;  %v1066_v22 = vld [vmem:[#allocation2 + $0x90] sm:$0xff]  ;;  %v1073_v23 = vld [vmem:[#allocation2 + $0xa0] sm:$0xff]  ;;  %v1083_v26 = vpack.c.bf16 %v1058_v20, %v1057_v19  ;;  %v1052_v30 = vld [vmem:[#allocation2 + $0x48] sm:$0xff] }
 0x1bb   : > { %v1087_v27 = vpack.c.bf16 %v1066_v22, %v1065_v21  ;;  %v1091_v28 = vpack.c.bf16 %v1074_v24, %v1073_v23  ;;  %v1051_v29 = vld [vmem:[#allocation2 + $0x30] sm:$0xff]  ;;  %v1059_v31 = vld [vmem:[#allocation2 + $0x8] sm:$0xff]  ;;  %v1060_v32 = vld [vmem:[#allocation2 + $0x78] sm:$0xff] }
 0x1bc   : > { %v1067_v33 = vld [vmem:[#allocation2 + $0x70] sm:$0xff]  ;;  %v1068_v34 = vld [vmem:[#allocation2 + $0xc0] sm:$0xff]  ;;  %v1076_v36 = vld [vmem:[#allocation2 + $0x98] sm:$0xff]  ;;  %v1080_v37 = vpack.c.bf16 %v1052_v30, %v1051_v29  ;;  %v1084_v38 = vpack.c.bf16 %v1060_v32, %v1059_v31 }
 0x1bd   : > { %1164 = vmatpush.bf16.msra.mxu0 %v1726_v52  ;;  %1850 = vmatpush.bf16.msra.mxu1 %v1726_v52  ;;  %v1075_v35 = vld [vmem:[#allocation2 + $0x20] sm:$0xff]  ;;  %v1088_v39 = vpack.c.bf16 %v1068_v34, %v1067_v33 }
 0x1be   : > { %1851 = vmatpush.bf16.msra.mxu2 %v1726_v52  ;;  %1852 = vmatpush.bf16.msra.mxu3 %v1726_v52  ;;  %v1092_v40 = vpack.c.bf16 %v1076_v36, %v1075_v35  ;;  %v2351_v43 = vld [vmem:[%s2426_s4] ss:$0 sm:$0xff] }
 0x1c1   : > { %1165 = vmatpush.bf16.msra.mxu0 %v1725_v53  ;;  %1853 = vmatpush.bf16.msra.mxu1 %v1725_v53 }
 0x1c2   : > { %1854 = vmatpush.bf16.msra.mxu2 %v1725_v53  ;;  %1855 = vmatpush.bf16.msra.mxu3 %v1725_v53 }
 0x1c5   : > { %1166 = vmatpush.bf16.msra.mxu0 %v1724_v54  ;;  %1856 = vmatpush.bf16.msra.mxu1 %v1724_v54 }
 0x1c6   : > { %1857 = vmatpush.bf16.msra.mxu2 %v1724_v54  ;;  %1858 = vmatpush.bf16.msra.mxu3 %v1724_v54 }
 0x1c9   : > { %1167 = vmatpush.bf16.msra.mxu0 %v1723_v55  ;;  %1859 = vmatpush.bf16.msra.mxu1 %v1723_v55 }
 0x1ca   : > { %1860 = vmatpush.bf16.msra.mxu2 %v1723_v55  ;;  %1861 = vmatpush.bf16.msra.mxu3 %v1723_v55 }
 0x1cd   : > { %1168 = vmatpush.bf16.msra.mxu0 %v1722_v56  ;;  %1862 = vmatpush.bf16.msra.mxu1 %v1722_v56 }
 0x1ce   : > { %1863 = vmatpush.bf16.msra.mxu2 %v1722_v56  ;;  %1864 = vmatpush.bf16.msra.mxu3 %v1722_v56 }
 0x1d0   : > { %1169 = vmatmul.bf16.vlgmr.msra.gmra.mxu0 %v1077_v1  ;;  %1189 = vmatmul.bf16.vlgmr.msra.gmra.mxu1 %v1081_v2 }
 0x1d1   : > { %1209 = vmatmul.bf16.vlgmr.msra.gmra.mxu2 %v1085_v3  ;;  %1229 = vmatmul.bf16.vlgmr.msra.gmra.mxu3 %v1089_v4 }
 0x1e0   : > { %1174 = vmatmul.bf16.gmra.mxu0 %v1078_v13  ;;  %1194 = vmatmul.bf16.gmra.mxu1 %v1082_v14 }
 0x1e1   : > { %1214 = vmatmul.bf16.gmra.mxu2 %v1086_v15  ;;  %1234 = vmatmul.bf16.gmra.mxu3 %v1090_v16 }
 0x1f0   : > { %1179 = vmatmul.bf16.gmra.mxu0 %v1079_v25  ;;  %1199 = vmatmul.bf16.gmra.mxu1 %v1083_v26 }
 0x1f1   : > { %1219 = vmatmul.bf16.gmra.mxu2 %v1087_v27  ;;  %1239 = vmatmul.bf16.gmra.mxu3 %v1091_v28 }
 0x200   : > { %1184 = vmatmul.bf16.gmra.mxu0 %v1080_v37  ;;  %1204 = vmatmul.bf16.gmra.mxu1 %v1084_v38 }
 0x201   : > { %1224 = vmatmul.bf16.gmra.mxu2 %v1088_v39  ;;  %1244 = vmatmul.bf16.gmra.mxu3 %v1092_v40 }
 0x24d   : > { %v1170_v41 = vpop.f32.mrf.mxu0  ;;  %v1190_v42 = vpop.f32.mrf.mxu1 }
 0x24e   : > { %v1171_v44 = vadd.f32 %v2351_v43, %v1170_v41  ;;  %v1191_v45 = vadd.f32 %v2351_v43, %v1190_v42 }
 0x250   : > { %1924 = vtanh.f32 %v1171_v44 }
 0x251   : > { %1926 = vtanh.f32 %v1191_v45 }
 0x254   : > { %v1210_v46 = vpop.f32.mrf.mxu2  ;;  %v1230_v47 = vpop.f32.mrf.mxu3 }
 0x255   : > { %v1172_v48 = vpop.f32.mrf.mxu0  ;;  %v1192_v49 = vpop.f32.mrf.mxu1  ;;  %v1211_v52 = vadd.f32 %v2351_v43, %v1210_v46  ;;  %v1231_v53 = vadd.f32 %v2351_v43, %v1230_v47 }
 0x256   : > { %v1173_v50 = vadd.f32 %v2351_v43, %v1172_v48  ;;  %v1193_v51 = vadd.f32 %v2351_v43, %v1192_v49  ;;  %v1925_v56 = vpop.eup %1924 }
 0x257   : > { %v1927_v61 = vpop.eup %1926 }
 0x258   : > { %1928 = vtanh.f32 %v1173_v50 }
 0x259   : > { %1930 = vtanh.f32 %v1193_v51 }
 0x25a   : > { %1932 = vtanh.f32 %v1211_v52 }
 0x25b   : > { %1934 = vtanh.f32 %v1231_v53 }
 0x25c   : > { %v1212_v54 = vpop.f32.mrf.mxu2  ;;  %v1232_v55 = vpop.f32.mrf.mxu3 }
 0x25d   : > { %v1213_v57 = vadd.f32 %v2351_v43, %v1212_v54  ;;  %v1233_v58 = vadd.f32 %v2351_v43, %v1232_v55  ;;  %v1175_v59 = vpop.f32.mrf.mxu0  ;;  %v1195_v60 = vpop.f32.mrf.mxu1 }
 0x25e   : > { %v1929_v62 = vpop.eup %1928  ;;  %v1176_v3 = vadd.f32 %v2351_v43, %v1175_v59  ;;  %v1196_v5 = vadd.f32 %v2351_v43, %v1195_v60 }
 0x25f   : > { %1936 = vtanh.f32 %v1213_v57  ;;  %v1931_v63 = vpop.eup %1930  ;;  %v1733_v0 = vpack.c.bf16 %v1929_v62, %v1925_v56 }
 0x260   : > { %1938 = vtanh.f32 %v1233_v58  ;;  %v1753_v1 = vpack.c.bf16 %v1931_v63, %v1927_v61  ;;  %v1933_v2 = vpop.eup %1932 }
 0x261   : > { %1734 = vst [vmem:[%s2229_s17] sm:$0xff] %v1733_v0   ;;  %v1935_v4 = vpop.eup %1934  ;;  %1940 = vtanh.f32 %v1176_v3 }
 0x262   : > { %1813 = vst [vmem:[%s2229_s17 + $0x20] sm:$0xff] %v1753_v1   ;;  %1942 = vtanh.f32 %v1196_v5 }
 0x264   : > { %v1215_v6 = vpop.f32.mrf.mxu2  ;;  %v1235_v7 = vpop.f32.mrf.mxu3 }
 0x265   : > { %v1937_v8 = vpop.eup %1936  ;;  %v1177_v9 = vpop.f32.mrf.mxu0  ;;  %v1216_v16 = vadd.f32 %v2351_v43, %v1215_v6  ;;  %v1236_v17 = vadd.f32 %v2351_v43, %v1235_v7 }
 0x266   : > { %v1197_v10 = vpop.f32.mrf.mxu1  ;;  %v1939_v11 = vpop.eup %1938  ;;  %v1773_v12 = vpack.c.bf16 %v1937_v8, %v1933_v2  ;;  %v1178_v13 = vadd.f32 %v2351_v43, %v1177_v9 }
 0x267   : > { %v1198_v14 = vadd.f32 %v2351_v43, %v1197_v10  ;;  %v1793_v15 = vpack.c.bf16 %v1939_v11, %v1935_v4  ;;  %v1941_v20 = vpop.eup %1940 }
 0x268   : > { %1817 = vst [vmem:[%s2229_s17 + $0x40] sm:$0xff] %v1773_v12   ;;  %1944 = vtanh.f32 %v1178_v13  ;;  %v1943_v25 = vpop.eup %1942 }
 0x269   : > { %1821 = vst [vmem:[%s2229_s17 + $0x60] sm:$0xff] %v1793_v15   ;;  %1946 = vtanh.f32 %v1198_v14 }
 0x26a   : > { %1948 = vtanh.f32 %v1216_v16 }
 0x26b   : > { %1950 = vtanh.f32 %v1236_v17 }
 0x26c   : > { %v1217_v18 = vpop.f32.mrf.mxu2  ;;  %v1237_v19 = vpop.f32.mrf.mxu3 }
 0x26d   : > { %v1218_v21 = vadd.f32 %v2351_v43, %v1217_v18  ;;  %v1238_v22 = vadd.f32 %v2351_v43, %v1237_v19  ;;  %v1180_v23 = vpop.f32.mrf.mxu0 }
 0x26e   : > { %v1200_v24 = vpop.f32.mrf.mxu1  ;;  %v1945_v26 = vpop.eup %1944  ;;  %v1181_v31 = vadd.f32 %v2351_v43, %v1180_v23 }
 0x26f   : > { %1952 = vtanh.f32 %v1218_v21  ;;  %v1947_v27 = vpop.eup %1946  ;;  %v1738_v28 = vpack.c.bf16 %v1945_v26, %v1941_v20  ;;  %v1201_v33 = vadd.f32 %v2351_v43, %v1200_v24 }
 0x270   : > { %1954 = vtanh.f32 %v1238_v22  ;;  %v1758_v29 = vpack.c.bf16 %v1947_v27, %v1943_v25  ;;  %v1949_v30 = vpop.eup %1948 }
 0x271   : > { %1810 = vst [vmem:[%s2229_s17 + $0x8] sm:$0xff] %v1738_v28   ;;  %v1951_v32 = vpop.eup %1950  ;;  %1956 = vtanh.f32 %v1181_v31 }
 0x272   : > { %1814 = vst [vmem:[%s2229_s17 + $0x28] sm:$0xff] %v1758_v29   ;;  %1958 = vtanh.f32 %v1201_v33 }
 0x274   : > { %v1220_v34 = vpop.f32.mrf.mxu2  ;;  %v1240_v35 = vpop.f32.mrf.mxu3 }
 0x275   : > { %v1953_v36 = vpop.eup %1952  ;;  %v1182_v37 = vpop.f32.mrf.mxu0  ;;  %v1221_v45 = vadd.f32 %v2351_v43, %v1220_v34  ;;  %v1241_v46 = vadd.f32 %v2351_v43, %v1240_v35 }
 0x276   : > { %v1202_v38 = vpop.f32.mrf.mxu1  ;;  %v1955_v39 = vpop.eup %1954  ;;  %v1778_v40 = vpack.c.bf16 %v1953_v36, %v1949_v30  ;;  %v1183_v41 = vadd.f32 %v2351_v43, %v1182_v37 }
 0x277   : > { %v1203_v42 = vadd.f32 %v2351_v43, %v1202_v38  ;;  %v1798_v44 = vpack.c.bf16 %v1955_v39, %v1951_v32  ;;  %v1957_v49 = vpop.eup %1956 }
 0x278   : > { %1818 = vst [vmem:[%s2229_s17 + $0x48] sm:$0xff] %v1778_v40   ;;  %1960 = vtanh.f32 %v1183_v41  ;;  %v1959_v54 = vpop.eup %1958 }
 0x279   : > { %1822 = vst [vmem:[%s2229_s17 + $0x68] sm:$0xff] %v1798_v44   ;;  %1962 = vtanh.f32 %v1203_v42 }
 0x27a   : > { %1964 = vtanh.f32 %v1221_v45 }
 0x27b   : > { %1966 = vtanh.f32 %v1241_v46 }
 0x27c   : > { %v1222_v47 = vpop.f32.mrf.mxu2  ;;  %v1242_v48 = vpop.f32.mrf.mxu3 }
 0x27d   : > { %v1223_v50 = vadd.f32 %v2351_v43, %v1222_v47  ;;  %v1243_v51 = vadd.f32 %v2351_v43, %v1242_v48  ;;  %v1185_v52 = vpop.f32.mrf.mxu0 }
 0x27e   : > { %v1205_v53 = vpop.f32.mrf.mxu1  ;;  %v1961_v55 = vpop.eup %1960  ;;  %v1186_v60 = vadd.f32 %v2351_v43, %v1185_v52 }
 0x27f   : > { %1968 = vtanh.f32 %v1223_v50  ;;  %v1963_v56 = vpop.eup %1962  ;;  %v1743_v57 = vpack.c.bf16 %v1961_v55, %v1957_v49  ;;  %v1206_v62 = vadd.f32 %v2351_v43, %v1205_v53 }
 0x280   : > { %1970 = vtanh.f32 %v1243_v51  ;;  %v1763_v58 = vpack.c.bf16 %v1963_v56, %v1959_v54  ;;  %v1965_v59 = vpop.eup %1964 }
 0x281   : > { %1811 = vst [vmem:[%s2229_s17 + $0x10] sm:$0xff] %v1743_v57   ;;  %v1967_v61 = vpop.eup %1966  ;;  %1972 = vtanh.f32 %v1186_v60 }
 0x282   : > { %1815 = vst [vmem:[%s2229_s17 + $0x30] sm:$0xff] %v1763_v58   ;;  %1974 = vtanh.f32 %v1206_v62 }
 0x284   : > { %v1225_v63 = vpop.f32.mrf.mxu2  ;;  %v1245_v0 = vpop.f32.mrf.mxu3 }
 0x285   : > { %v1969_v1 = vpop.eup %1968  ;;  %v1187_v2 = vpop.f32.mrf.mxu0  ;;  %v1226_v9 = vadd.f32 %v2351_v43, %v1225_v63  ;;  %v1246_v10 = vadd.f32 %v2351_v43, %v1245_v0 }
 0x286   : > { %v1207_v3 = vpop.f32.mrf.mxu1  ;;  %v1971_v4 = vpop.eup %1970  ;;  %v1783_v5 = vpack.c.bf16 %v1969_v1, %v1965_v59  ;;  %v1188_v6 = vadd.f32 %v2351_v43, %v1187_v2 }
 0x287   : > { %v1208_v7 = vadd.f32 %v2351_v43, %v1207_v3  ;;  %v1803_v8 = vpack.c.bf16 %v1971_v4, %v1967_v61  ;;  %v1973_v13 = vpop.eup %1972 }
 0x288   : > { %1819 = vst [vmem:[%s2229_s17 + $0x50] sm:$0xff] %v1783_v5   ;;  %1976 = vtanh.f32 %v1188_v6  ;;  %v1975_v16 = vpop.eup %1974 }
 0x289   : > { %1823 = vst [vmem:[%s2229_s17 + $0x70] sm:$0xff] %v1803_v8   ;;  %1978 = vtanh.f32 %v1208_v7 }
 0x28a   : > { %1980 = vtanh.f32 %v1226_v9 }
 0x28b   : > { %1982 = vtanh.f32 %v1246_v10 }
 0x28c   : > { %v1227_v11 = vpop.f32.mrf.mxu2  ;;  %v1247_v12 = vpop.f32.mrf.mxu3 }
 0x28d   : > { %v1228_v14 = vadd.f32 %v2351_v43, %v1227_v11  ;;  %v1248_v15 = vadd.f32 %v2351_v43, %v1247_v12 }
 0x28e   : > { %v1977_v17 = vpop.eup %1976 }
 0x28f   : > { %1984 = vtanh.f32 %v1228_v14  ;;  %v1979_v18 = vpop.eup %1978  ;;  %v1748_v19 = vpack.c.bf16 %v1977_v17, %v1973_v13 }
 0x290   : > { %1986 = vtanh.f32 %v1248_v15  ;;  %v1768_v20 = vpack.c.bf16 %v1979_v18, %v1975_v16  ;;  %v1981_v21 = vpop.eup %1980 }
 0x291   : > { %1812 = vst [vmem:[%s2229_s17 + $0x18] sm:$0xff] %v1748_v19   ;;  %v1983_v22 = vpop.eup %1982 }
 0x292   : > { %1816 = vst [vmem:[%s2229_s17 + $0x38] sm:$0xff] %v1768_v20  }
 0x295   : > { %v1985_v23 = vpop.eup %1984 }
 0x296   : > { %v1987_v24 = vpop.eup %1986  ;;  %v1788_v25 = vpack.c.bf16 %v1985_v23, %v1981_v21 }
 0x297   : > { %v1808_v26 = vpack.c.bf16 %v1987_v24, %v1983_v22 }
 0x298   : > { %1820 = vst [vmem:[%s2229_s17 + $0x58] sm:$0xff] %v1788_v25  }
 0x299   : > { %1824 = vst [vmem:[%s2229_s17 + $0x78] sm:$0xff] %v1808_v26  }
 0x29a PF: > { %s23_s28 = sadd.s32 1, %s2056_s28   ;;  %s2428_s22 = smov %s2036_s23 }
 0x29b   : > { %p20_p0 = scmp.ge.s32.totalorder %s23_s28, 6   ;;  %s2429_s23 = smov %s2146_s15 }
 0x29c   : > { %s2430_s24 = smov %s2048_s26  ;;  %s2431_s25 = smov %s2052_s27 }
 0x29d   : > { %s2432_s26 = smov %s2437_s0  ;;  %s2433_s27 = smov %s2439_s29 }
 0x29e   :  { %22 = sbr.rel (!%p20_p0) target bundleno = 10 (0xa), region = 122 }

// kernel: dgn_forward.2
= control target key start
LH: loop header
LB: loop body
LE: loop exit
PB: predicated region body
PF: predicated region fallthrough
CT: control target
= control target key end

     0   :  { %s1989_s21 = smov [#allocation4]   ;;  %s2337_s0 = inlined_call_operand.vmem [shape: s32[4], index: 0, kind: input, shape index: {}]   ;;  %s2338_s1 = inlined_call_operand.hbm [shape: bf16[512,512], index: 1, kind: input, shape index: {}]   ;;  %s2339_s2 = inlined_call_operand.vmem [shape: bf16[512,128], index: 2, kind: input, shape index: {}]   ;;  %s2340_s3 = inlined_call_operand.vmem [shape: bf16[128,128], index: 3, kind: input, shape index: {}]   ;;  %s2341_s4 = inlined_call_operand.vmem [shape: f32[1,128], index: 4, kind: input, shape index: {}]   ;;  %s2342_s5 = inlined_call_operand.vmem [shape: bf16[512,128], index: 5, kind: output, shape index: {}]  }
   0x1   :  { %s11_s20 = sshll.u32 %s2337_s0, 4  ;;  %s12_s20 = int_to_ptr.vmem [resolvable:$true] %s11_s20 }
   0x2   :  { %14 = dma.vmem_to_smem %s12_s20, 16, %s1989_s21, [#allocation3] }
   0x3   :  { %1951 = dma.done.wait [#allocation3], 16 }
   0x4   :  { %1952 = vsyncadd [#allocation3], 4294967280 }
   0x5   :  { %17 = sfence }
   0x6   :  { %18 = vsyncpa [#allocation6], 0 }
   0x7   :  { %20 = vsyncpa [#allocation6 + $0x1], 0  ;;  %s2027_s22 = smov 0   ;;  %s2029_s23 = smov 0  }
   0x8   :  { %s2031_s24 = smov 0   ;;  %s2033_s25 = smov 0  }
   0x9   :  { %s2035_s26 = smov 0   ;;  %s2037_s27 = smov 0  }
   0xa   :  { %s2039_s0 = smov 0   ;;  %s2041_s28 = smov 0  }
   0xb LB: > { %s35_s29 = sadd.s32 1, %s1979_s27  ;;  %s38_s30 = sadd.s32 1, %s1983_s0  ;;  %s1987_s28 = sphi %s2041_s28, %s26_s28   ;;  %s1983_s0 = sphi %s2039_s0, %s2359_s0   ;;  %s1979_s27 = sphi %s2037_s27, %s2358_s27   ;;  %s1975_s26 = sphi %s2035_s26, %s2357_s26   ;;  %s1971_s25 = sphi %s2033_s25, %s2356_s25   ;;  %s1967_s24 = sphi %s2031_s24, %s2355_s24   ;;  %s1963_s23 = sphi %s2029_s23, %s2354_s23   ;;  %s1959_s22 = sphi %s2027_s22, %s2353_s22  }
   0xc   : > { %p36_p0 = scmp.ge.s32.totalorder %s35_s29, 2  ;;  %s1294_s6 = sshll.u32 %s1983_s0, 1 }
   0xd   : > { %s1292_s7 = sadd.s32 4294967295, %s1987_s28   ;;  %s43_s8 = sadd.s32 %s1979_s27, %s1294_s6 }
   0xe   : > { %s2361_s29 = smov (%p36_p0, %s35_s29), 0  ;;  %s2363_s30 = smov (!%p36_p0, %s38_s30), %s1983_s0 }
   0xf   : > { %2345 = sst [smem:[#allocation11_spill]] %s2361_s29  ;;  %p40_p1 = scmp.ge.s32.totalorder %s2363_s30, 2 }
  0x10   : > { %p60_p2 = scmp.ne.s32.totalorder %s1967_s24, %s1963_s23  ;;  %p61_p3 = scmp.eq.s32.totalorder %s1987_s28, 0 }
  0x11   : > { %p66_p4 = scmp.ne.s32.totalorder %s1963_s23, %s1959_s22  ;;  %s2365_s30 = smov (%p40_p1, %s2363_s30), 0 }
  0x12   : > { %2346 = sst [smem:[#allocation12_spill]] %s2365_s30  ;;  %p67_p5 = scmp.eq.s32.totalorder %s1292_s7, 0 }
  0x13   : > { %s44_s9 = sld [smem:[#allocation4 + %s43_s8]]  ;;  %s1295_s10 = sshll.u32 %s2365_s30, 1 }
  0x14   : > { %p2080_p6 = por %p61_p3, %p60_p2  ;;  %s46_s12 = sadd.s32 %s1295_s10, %s2361_s29 }
  0x15   : > { %p2085_p7 = por %p67_p5, %p66_p4  ;;  %s47_s14 = sld [smem:[#allocation4 + %s46_s12]] }
  0x16   : > { %s48_s15 = ssub.s32 %s1983_s0, %s2365_s30  ;;  %p1742_p8 = scmp.lt.s32.totalorder %s1987_s28, 4 }
  0x17   : > { %s188_s16 = sand.u32 1, %s1967_s24   ;;  %s2367_s8 = smov (!%p2080_p6, %s43_s8), 0 }
  0x18   : > { %s1732_s17 = scalar_select %p2080_p6, [#allocation4], [#allocation7] }
  0x19   : > { %s53_s19 = sadd.s32 1, %s1967_s24  ;;  %s1298_s21 = sshll.u32 %s188_s16, 8 }
  0x1a   : > { %p2100_p10 = pnand %p1742_p8, %p2080_p6  ;;  %s2369_s17 = smov (!%p1742_p8, %s1732_s17), [#allocation8] }
  0x1b   : > { %s49_s18 = ssub.s32 %s44_s9, %s47_s14  ;;  %s2371_s8 = smov (!%p1742_p8, %s2367_s8), 0 }
  0x1c   : > { %s50_s20 = sor.u32 %s49_s18, %s48_s15  ;;  %s195_s7 = sld [smem:[%s2369_s17 + %s2371_s8]] }
  0x1d   : > { %p51_p9 = scmp.eq.s32.totalorder %s50_s20, 0  ;;  %p1304_p11 = scmp.ge.s32.totalorder %s1987_s28, 1 }
  0x1e   : > { %p214_p12 = scmp.lt.s32.totalorder %s1987_s28, 5  ;;  %s192_s10 = scalar_lea.vmem [#allocation5], %s1298_s21 }
  0x1f   : > { %s2105_s6 = scalar_select %p51_p9, %s1967_s24, %s53_s19  }
  0x20   : > { %s2109_s12 = sshll.u32 %s192_s10, 4  ;;  %s1540_s9 = sshll.u32 %s1983_s0, 7  ;;  %s207_s12 = int_to_ptr.vmem [resolvable:$true] %s2109_s12 }
  0x21   : > { %p2112_p13 = pnand %p1304_p11, %p214_p12  ;;  %s189_s21 = scalar_lea.sflag [#allocation6], %s188_s16 }
  0x22   : > { %s1301_s11 = sshll.u32 %s195_s7, 1  ;;  %p1893_p1 = pneg %p2100_p10 }
  0x23   : > { %s201_s15 = sadd.s32 %s1540_s9, %s1301_s11  ;;  %s1896_s9 = scalar_lea.hbm %s2338_s1, 1024 }
  0x24   : > { %s1303_s18 = sshll.u32 %s201_s15, 2 }
  0x25   : > { %s203_s8 = scalar_lea.hbm %s2338_s1, %s1303_s18 }
  0x26   : > { %s204_s17 = sshll.u32 %s203_s8, 4  ;;  %s205_s17 = int_to_ptr.hbm [resolvable:$true] %s204_s17 }
  0x27   : > { %s1889_s30 = sshra.s32 %s205_s17, 4  ;;  %s1890_s30 = int_to_ptr.hbm [resolvable:$true] %s1889_s30 }
  0x28   : > { %s1891_s10 = scalar_lea.hbm %s1890_s30, 256  ;;  %p1897_p4 = scmp.lt.s32.totalorder %s1890_s30, %s2338_s1 }
  0x29   : > { %p1892_p0 = scmp.ne.s32.totalorder %s1890_s30, %s1891_s10  ;;  %p1898_p5 = scmp.lt.s32.totalorder %s1896_s9, %s1891_s10 }
  0x2b   : > { %p1894_p2 = pnand %p1893_p1, %p1892_p0  ;;  %p1899_p6 = por %p1898_p5, %p1897_p4 }
  0x2d   : > { %p1895_p3 = pneg %p1894_p2 }
  0x2f   : > { %p1900_p8 = pnand %p1899_p6, %p1895_p3 }
  0x31   : > { %1903 = shalt.err (!%p1900_p8)
}
  0x32   : > { %s1990_s16 = smov 256   ;;  %s1991_s18 = smov 128  }
  0x33   : > { %s1992_s19 = smov 8   ;;  %218 = sbr.rel (%p2112_p13) target bundleno = 643 (0x283), region = 36 }
  0x34   : > { %1741 = dma.hbm_to_vmem [thread:$0]  (!%p2100_p10), %s205_s17, 4096, %s207_s12, %s189_s21, %s1990_s16, %s1991_s18, %s1992_s19  }
  0x35   : > { %s220_s29 = sand.u32 (!%p2112_p13), 1, %s1963_s23  }
  0x36   : > { %s1305_s20 = sshll.u32 (!%p2112_p13), %s220_s29, 8  ;;  %s221_s8 = scalar_lea.sflag (!%p2112_p13), [#allocation6], %s220_s29 }
  0x37   : > { %s2133_s7 = scalar_lea.vmem (!%p2112_p13), [#allocation5], %s1305_s20 }
  0x38   : > { %1954 = dma.done.wait (%p2085_p7), %s221_s8, 4096  }
  0x39   : > { %1956 = vsyncadd (%p2085_p7), %s221_s8, 4294963200  ;;  %s1306_s30 = sshll.u32 %s1975_s26, 5  ;;  %p1308_p10 = scmp.ne.s32.totalorder %s1971_s25, 0 }
  0x3a   : > { %p256_p9 = scmp.lt.s32.totalorder %s1306_s30, 63 }
  0x3b   : > { %264 = sbr.rel (%p1308_p10) target bundleno = 97 (0x61), region = 44 }
  0x3c   : > { %s2373_s30 = smov (!%p256_p9, %s1306_s30), 63 }
  0x3d   : > { %s1307_s22 = sshll.u32 %s2373_s30, 2 }
  0x3e   : > { %s2143_s17 = scalar_lea.vmem %s2342_s5, %s1307_s22 }
  0x40   : > { %v1993_v0 = vmov 0.0  }
  0x41   : > { %265 = vst [vmem:[#allocation2 + $0xb0] sm:$0xff] %v1993_v0 }
  0x42   : > { %266 = vst [vmem:[#allocation2] sm:$0xff] %v1993_v0 }
  0x43   : > { %267 = vst [vmem:[#allocation2 + $0xd8] sm:$0xff] %v1993_v0 }
  0x44   : > { %268 = vst [vmem:[#allocation2 + $0x18] sm:$0xff] %v1993_v0 }
  0x45   : > { %269 = vst [vmem:[#allocation2 + $0x50] sm:$0xff] %v1993_v0 }
  0x46   : > { %270 = vst [vmem:[#allocation2 + $0x68] sm:$0xff] %v1993_v0 }
  0x47   : > { %271 = vst [vmem:[#allocation2 + $0x30] sm:$0xff] %v1993_v0 }
  0x48   : > { %272 = vst [vmem:[#allocation2 + $0x48] sm:$0xff] %v1993_v0 }
  0x49   : > { %273 = vst [vmem:[#allocation2 + $0x80] sm:$0xff] %v1993_v0 }
  0x4a   : > { %274 = vst [vmem:[#allocation2 + $0x88] sm:$0xff] %v1993_v0 }
  0x4b   : > { %275 = vst [vmem:[#allocation2 + $0xe8] sm:$0xff] %v1993_v0 }
  0x4c   : > { %276 = vst [vmem:[#allocation2 + $0xb8] sm:$0xff] %v1993_v0 }
  0x4d   : > { %277 = vst [vmem:[#allocation2 + $0x60] sm:$0xff] %v1993_v0 }
  0x4e   : > { %278 = vst [vmem:[#allocation2 + $0xf0] sm:$0xff] %v1993_v0 }
  0x4f   : > { %279 = vst [vmem:[#allocation2 + $0x8] sm:$0xff] %v1993_v0 }
  0x50   : > { %280 = vst [vmem:[#allocation2 + $0x78] sm:$0xff] %v1993_v0 }
  0x51   : > { %281 = vst [vmem:[#allocation2 + $0x38] sm:$0xff] %v1993_v0 }
  0x52   : > { %282 = vst [vmem:[#allocation2 + $0x58] sm:$0xff] %v1993_v0 }
  0x53   : > { %283 = vst [vmem:[#allocation2 + $0x40] sm:$0xff] %v1993_v0 }
  0x54   : > { %284 = vst [vmem:[#allocation2 + $0xc8] sm:$0xff] %v1993_v0 }
  0x55   : > { %285 = vst [vmem:[#allocation2 + $0xe0] sm:$0xff] %v1993_v0 }
  0x56   : > { %286 = vst [vmem:[#allocation2 + $0x90] sm:$0xff] %v1993_v0 }
  0x57   : > { %287 = vst [vmem:[#allocation2 + $0x70] sm:$0xff] %v1993_v0 }
  0x58   : > { %288 = vst [vmem:[#allocation2 + $0xc0] sm:$0xff] %v1993_v0 }
  0x59   : > { %289 = vst [vmem:[#allocation2 + $0xa8] sm:$0xff] %v1993_v0 }
  0x5a   : > { %290 = vst [vmem:[#allocation2 + $0xd0] sm:$0xff] %v1993_v0 }
  0x5b   : > { %291 = vst [vmem:[#allocation2 + $0x10] sm:$0xff] %v1993_v0 }
  0x5c   : > { %292 = vst [vmem:[#allocation2 + $0x28] sm:$0xff] %v1993_v0 }
  0x5d   : > { %293 = vst [vmem:[#allocation2 + $0xa0] sm:$0xff] %v1993_v0 }
  0x5e   : > { %294 = vst [vmem:[#allocation2 + $0xf8] sm:$0xff] %v1993_v0 }
  0x5f   : > { %295 = vst [vmem:[#allocation2 + $0x20] sm:$0xff] %v1993_v0 }
  0x60   : > { %296 = vst [vmem:[#allocation2 + $0x98] sm:$0xff] %v1993_v0 }
  0x61 PF: > { %s1309_s13 = sshll.u32 %s1975_s26, 1 }
  0x62   : > { %s298_s21 = sadd.s32 %s1971_s25, %s1309_s13 }
  0x63   : > { %s299_s10 = sld [smem:[#allocation4 + %s298_s21]] }
  0x69   : > { %p1310_p7 = scmp.ne.s32.totalorder %s299_s10, %s1971_s25 }
  0x6a   : > { %s1311_s9 = sshll.u32 (!%p1310_p7), %s1971_s25, 8 }
  0x6b   : > { %303 = sbr.rel (%p1310_p7) target bundleno = 402 (0x192), region = 48  ;;  %s305_s11 = sshra.s32 (!%p1310_p7), %s1311_s9, 3 }
  0x6c   : > { %s1312_s15 = sshll.u32 (!%p1310_p7), %s305_s11, 2 }
  0x6d   : > { %s2153_s19 = scalar_lea.vmem (!%p1310_p7), %s2339_s2, %s1312_s15 }
  0x70   : > { %v1548_v1 = vld [vmem:[%s2153_s19 + $0x38] sm:$0xff]  ;;  %v1547_v3 = vld [vmem:[%s2153_s19 + $0x30] sm:$0xff]  ;;  %v1546_v5 = vld [vmem:[%s2153_s19 + $0x28] sm:$0xff] }
  0x71   : > { %v1556_v2 = vld [vmem:[%s2153_s19 + $0x78] sm:$0xff]  ;;  %661 = vmatpush.bf16.msra.mxu0 %v1548_v1  ;;  %1692 = vmatpush.bf16.msra.mxu2 %v1548_v1  ;;  %v1555_v4 = vld [vmem:[%s2153_s19 + $0x70] sm:$0xff]  ;;  %v1554_v6 = vld [vmem:[%s2153_s19 + $0x68] sm:$0xff] }
  0x72   : > { %750 = vmatpush.bf16.msra.mxu1 %v1556_v2  ;;  %1700 = vmatpush.bf16.msra.mxu3 %v1556_v2  ;;  %v1545_v7 = vld [vmem:[%s2153_s19 + $0x20] sm:$0xff]  ;;  %v1544_v9 = vld [vmem:[%s2153_s19 + $0x18] sm:$0xff]  ;;  %v1543_v11 = vld [vmem:[%s2153_s19 + $0x10] sm:$0xff] }
  0x73   : > { %v1553_v8 = vld [vmem:[%s2153_s19 + $0x60] sm:$0xff]  ;;  %v1552_v10 = vld [vmem:[%s2153_s19 + $0x58] sm:$0xff]  ;;  %v1551_v12 = vld [vmem:[%s2153_s19 + $0x50] sm:$0xff] }
  0x74   : > { %v1542_v13 = vld [vmem:[%s2153_s19 + $0x8] sm:$0xff]  ;;  %v1315_v15 = vld [vmem:[%s2133_s7] sm:$0xf]  ;;  %v1557_v21 = vld [vmem:[%s2133_s7 + $0x4] sm:$0xf] }
  0x75   : > { %662 = vmatpush.bf16.msra.mxu0 %v1547_v3  ;;  %1693 = vmatpush.bf16.msra.mxu2 %v1547_v3  ;;  %v1550_v14 = vld [vmem:[%s2153_s19 + $0x48] sm:$0xff]  ;;  %v1541_v16 = vld [vmem:[%s2153_s19] sm:$0xff]  ;;  %v1323_v29 = vld [vmem:[%s2133_s7 + $0x10] sm:$0xf] }
  0x76   : > { %751 = vmatpush.bf16.msra.mxu1 %v1555_v4  ;;  %1701 = vmatpush.bf16.msra.mxu3 %v1555_v4  ;;  %v1558_v17 = vld [vmem:[%s2133_s7 + $0x4] sm:$0xf0]  ;;  %v1379_v18 = vld [vmem:[%s2133_s7 + $0x80] sm:$0xf]  ;;  %v1317_v22 = vld [vmem:[%s2133_s7 + $0x8] sm:$0xf0] }
  0x77   : > { %v1549_v19 = vld [vmem:[%s2153_s19 + $0x40] sm:$0xff]  ;;  %v1574_v20 = vld [vmem:[%s2133_s7 + $0x84] sm:$0xf0]  ;;  %v1381_v24 = vld [vmem:[%s2133_s7 + $0x88] sm:$0xf0]  ;;  %v1316_v25 = vor.u32 %v1558_v17, %v1315_v15  ;;  %v1320_v27 = vor.u32 %v1557_v21, %v1317_v22 }
  0x78   : > { %v1573_v23 = vld [vmem:[%s2133_s7 + $0x84] sm:$0xf]  ;;  %v1380_v26 = vor.u32 %v1574_v20, %v1379_v18  ;;  %v1560_v30 = vld [vmem:[%s2133_s7 + $0x14] sm:$0xf0]  ;;  %v1387_v31 = vld [vmem:[%s2133_s7 + $0x90] sm:$0xf] }
  0x79   : > { %663 = vmatpush.bf16.msra.mxu0 %v1546_v5  ;;  %1694 = vmatpush.bf16.msra.mxu2 %v1546_v5  ;;  %v1384_v28 = vor.u32 %v1573_v23, %v1381_v24  ;;  %v1576_v32 = vld [vmem:[%s2133_s7 + $0x94] sm:$0xf0]  ;;  %v1559_v33 = vld [vmem:[%s2133_s7 + $0x14] sm:$0xf]  ;;  %v1325_v34 = vld [vmem:[%s2133_s7 + $0x18] sm:$0xf0]  ;;  %v1324_v37 = vor.u32 %v1560_v30, %v1323_v29 }
  0x7a   : > { %752 = vmatpush.bf16.msra.mxu1 %v1554_v6  ;;  %1702 = vmatpush.bf16.msra.mxu3 %v1554_v6  ;;  %v1575_v35 = vld [vmem:[%s2133_s7 + $0x94] sm:$0xf]  ;;  %v1389_v36 = vld [vmem:[%s2133_s7 + $0x98] sm:$0xf0]  ;;  %v1388_v38 = vor.u32 %v1576_v32, %v1387_v31  ;;  %v1328_v39 = vor.u32 %v1559_v33, %v1325_v34  ;;  %v1331_v41 = vld [vmem:[%s2133_s7 + $0x20] sm:$0xf] }
  0x7b   : > { %v1392_v40 = vor.u32 %v1575_v35, %v1389_v36  ;;  %v1562_v42 = vld [vmem:[%s2133_s7 + $0x24] sm:$0xf0]  ;;  %v1395_v43 = vld [vmem:[%s2133_s7 + $0xa0] sm:$0xf]  ;;  %v1561_v45 = vld [vmem:[%s2133_s7 + $0x24] sm:$0xf] }
  0x7c   : > { %v1578_v44 = vld [vmem:[%s2133_s7 + $0xa4] sm:$0xf0]  ;;  %v1333_v46 = vld [vmem:[%s2133_s7 + $0x28] sm:$0xf0]  ;;  %v1577_v47 = vld [vmem:[%s2133_s7 + $0xa4] sm:$0xf]  ;;  %v1332_v49 = vor.u32 %v1562_v42, %v1331_v41 }
  0x7d   : > { %664 = vmatpush.bf16.msra.mxu0 %v1545_v7  ;;  %1695 = vmatpush.bf16.msra.mxu2 %v1545_v7  ;;  %v1397_v48 = vld [vmem:[%s2133_s7 + $0xa8] sm:$0xf0]  ;;  %v1396_v50 = vor.u32 %v1578_v44, %v1395_v43  ;;  %v1336_v51 = vor.u32 %v1561_v45, %v1333_v46  ;;  %v1339_v53 = vld [vmem:[%s2133_s7 + $0x30] sm:$0xf]  ;;  %v1564_v54 = vld [vmem:[%s2133_s7 + $0x34] sm:$0xf0] }
  0x7e   : > { %753 = vmatpush.bf16.msra.mxu1 %v1553_v8  ;;  %1703 = vmatpush.bf16.msra.mxu3 %v1553_v8  ;;  %v1400_v52 = vor.u32 %v1577_v47, %v1397_v48  ;;  %v1403_v55 = vld [vmem:[%s2133_s7 + $0xb0] sm:$0xf]  ;;  %v1580_v56 = vld [vmem:[%s2133_s7 + $0xb4] sm:$0xf0]  ;;  %v1563_v57 = vld [vmem:[%s2133_s7 + $0x34] sm:$0xf]  ;;  %v1340_v61 = vor.u32 %v1564_v54, %v1339_v53 }
  0x7f   : > { %v1341_v58 = vld [vmem:[%s2133_s7 + $0x38] sm:$0xf0]  ;;  %v1579_v59 = vld [vmem:[%s2133_s7 + $0xb4] sm:$0xf]  ;;  %v1404_v62 = vor.u32 %v1580_v56, %v1403_v55  ;;  %v1347_v1 = vld [vmem:[%s2133_s7 + $0x40] sm:$0xf] }
  0x80   : > { %v1405_v60 = vld [vmem:[%s2133_s7 + $0xb8] sm:$0xf0]  ;;  %v1344_v63 = vor.u32 %v1563_v57, %v1341_v58  ;;  %v1566_v2 = vld [vmem:[%s2133_s7 + $0x44] sm:$0xf0]  ;;  %v1411_v3 = vld [vmem:[%s2133_s7 + $0xc0] sm:$0xf] }
  0x81   : > { %665 = vmatpush.bf16.msra.mxu0 %v1544_v9  ;;  %1696 = vmatpush.bf16.msra.mxu2 %v1544_v9  ;;  %v1408_v0 = vor.u32 %v1579_v59, %v1405_v60  ;;  %v1582_v4 = vld [vmem:[%s2133_s7 + $0xc4] sm:$0xf0]  ;;  %v1565_v5 = vld [vmem:[%s2133_s7 + $0x44] sm:$0xf]  ;;  %v1349_v6 = vld [vmem:[%s2133_s7 + $0x48] sm:$0xf0]  ;;  %v1348_v9 = vor.u32 %v1566_v2, %v1347_v1 }
  0x82   : > { %754 = vmatpush.bf16.msra.mxu1 %v1552_v10  ;;  %1704 = vmatpush.bf16.msra.mxu3 %v1552_v10  ;;  %v1581_v7 = vld [vmem:[%s2133_s7 + $0xc4] sm:$0xf]  ;;  %v1413_v8 = vld [vmem:[%s2133_s7 + $0xc8] sm:$0xf0]  ;;  %v1412_v10 = vor.u32 %v1582_v4, %v1411_v3  ;;  %v1419_v15 = vld [vmem:[%s2133_s7 + $0xd0] sm:$0xf] }
  0x83   : > { %v1567_v17 = vld [vmem:[%s2133_s7 + $0x54] sm:$0xf]  ;;  %v1357_v18 = vld [vmem:[%s2133_s7 + $0x58] sm:$0xf0]  ;;  %v1569_v29 = vld [vmem:[%s2133_s7 + $0x64] sm:$0xf] }
  0x84   : > { %v1421_v20 = vld [vmem:[%s2133_s7 + $0xd8] sm:$0xf0]  ;;  %v1360_v23 = vor.u32 %v1567_v17, %v1357_v18  ;;  %v1365_v30 = vld [vmem:[%s2133_s7 + $0x68] sm:$0xf0]  ;;  %v1585_v31 = vld [vmem:[%s2133_s7 + $0xe4] sm:$0xf] }
  0x85   : > { %666 = vmatpush.bf16.msra.mxu0 %v1543_v11  ;;  %1697 = vmatpush.bf16.msra.mxu2 %v1543_v11  ;;  %v1352_v11 = vor.u32 %v1565_v5, %v1349_v6  ;;  %v1429_v32 = vld [vmem:[%s2133_s7 + $0xe8] sm:$0xf0]  ;;  %v1368_v35 = vor.u32 %v1569_v29, %v1365_v30  ;;  %v1571_v41 = vld [vmem:[%s2133_s7 + $0x74] sm:$0xf]  ;;  %v1373_v42 = vld [vmem:[%s2133_s7 + $0x78] sm:$0xf0] }
  0x86   : > { %755 = vmatpush.bf16.msra.mxu1 %v1551_v12  ;;  %1705 = vmatpush.bf16.msra.mxu3 %v1551_v12  ;;  %v1416_v12 = vor.u32 %v1581_v7, %v1413_v8  ;;  %v1432_v36 = vor.u32 %v1585_v31, %v1429_v32  ;;  %v1587_v43 = vld [vmem:[%s2133_s7 + $0xf4] sm:$0xf]  ;;  %v1437_v44 = vld [vmem:[%s2133_s7 + $0xf8] sm:$0xf0]  ;;  %v1376_v47 = vor.u32 %v1571_v41, %v1373_v42  ;;  %v342_v59 = vld [vmem:[#allocation2] sm:$0xff] }
  0x87   : > { %v1440_v48 = vor.u32 %v1587_v43, %v1437_v44  ;;  %v357_v55 = vld [vmem:[#allocation2 + $0x38] sm:$0xff]  ;;  %v361_v31 = vld [vmem:[#allocation2 + $0xe0] sm:$0xff]  ;;  %v362_v41 = vld [vmem:[#allocation2 + $0x90] sm:$0xff] }
  0x88   : > { %v358_v1 = vld [vmem:[#allocation2 + $0x58] sm:$0xff] }
  0x89   : > { %667 = vmatpush.bf16.msra.mxu0 %v1542_v13  ;;  %1698 = vmatpush.bf16.msra.mxu2 %v1542_v13  ;;  %v1355_v13 = vld [vmem:[%s2133_s7 + $0x50] sm:$0xf]  ;;  %v343_v5 = vld [vmem:[#allocation2 + $0xd8] sm:$0xff] }
  0x8a   : > { %756 = vmatpush.bf16.msra.mxu1 %v1550_v14  ;;  %1706 = vmatpush.bf16.msra.mxu3 %v1550_v14  ;;  %v1568_v14 = vld [vmem:[%s2133_s7 + $0x54] sm:$0xf0] }
  0x8b   : > { %v1356_v21 = vor.u32 %v1568_v14, %v1355_v13 }
  0x8d   : > { %668 = vmatpush.bf16.msra.mxu0 %v1541_v16  ;;  %1699 = vmatpush.bf16.msra.mxu2 %v1541_v16  ;;  %v1584_v16 = vld [vmem:[%s2133_s7 + $0xd4] sm:$0xf0] }
  0x8e   : > { %757 = vmatpush.bf16.msra.mxu1 %v1549_v19  ;;  %1707 = vmatpush.bf16.msra.mxu3 %v1549_v19  ;;  %v1583_v19 = vld [vmem:[%s2133_s7 + $0xd4] sm:$0xf]  ;;  %v1420_v22 = vor.u32 %v1584_v16, %v1419_v15  ;;  %v344_v15 = vld [vmem:[#allocation2 + $0x18] sm:$0xff] }
  0x8f   : > { %v1424_v24 = vor.u32 %v1583_v19, %v1421_v20 }
  0x90   : > { %669 = vmatmul.bf16.vlgmr.msra.gmra.mxu0 %v1316_v25  ;;  %709 = vmatmul.bf16.vlgmr.msra.gmra.mxu2 %v1380_v26  ;;  %v1363_v25 = vld [vmem:[%s2133_s7 + $0x60] sm:$0xf]  ;;  %v1570_v26 = vld [vmem:[%s2133_s7 + $0x64] sm:$0xf0] }
  0x91   : > { %758 = vmatmul.bf16.vlgmr.msra.gmra.mxu1 %v1320_v27  ;;  %798 = vmatmul.bf16.vlgmr.msra.gmra.mxu3 %v1384_v28  ;;  %v1427_v27 = vld [vmem:[%s2133_s7 + $0xe0] sm:$0xf]  ;;  %v1586_v28 = vld [vmem:[%s2133_s7 + $0xe4] sm:$0xf0]  ;;  %v1364_v33 = vor.u32 %v1570_v26, %v1363_v25  ;;  %v345_v25 = vld [vmem:[#allocation2 + $0x50] sm:$0xff] }
  0x92   : > { %v1428_v34 = vor.u32 %v1586_v28, %v1427_v27 }
  0xa0   : > { %674 = vmatmul.bf16.gmra.mxu0 %v1324_v37  ;;  %714 = vmatmul.bf16.gmra.mxu2 %v1388_v38  ;;  %v1371_v37 = vld [vmem:[%s2133_s7 + $0x70] sm:$0xf]  ;;  %v1572_v38 = vld [vmem:[%s2133_s7 + $0x74] sm:$0xf0] }
  0xa1   : > { %763 = vmatmul.bf16.gmra.mxu1 %v1328_v39  ;;  %803 = vmatmul.bf16.gmra.mxu3 %v1392_v40  ;;  %v1435_v39 = vld [vmem:[%s2133_s7 + $0xf0] sm:$0xf]  ;;  %v1588_v40 = vld [vmem:[%s2133_s7 + $0xf4] sm:$0xf0]  ;;  %v1372_v45 = vor.u32 %v1572_v38, %v1371_v37 }
  0xa2   : > { %v1436_v46 = vor.u32 %v1588_v40, %v1435_v39 }
  0xb0   : > { %679 = vmatmul.bf16.gmra.mxu0 %v1332_v49  ;;  %719 = vmatmul.bf16.gmra.mxu2 %v1396_v50  ;;  %v341_v50 = vld [vmem:[#allocation2 + $0xb0] sm:$0xff] }
  0xb1   : > { %768 = vmatmul.bf16.gmra.mxu1 %v1336_v51  ;;  %808 = vmatmul.bf16.gmra.mxu3 %v1400_v52 }
  0xc0   : > { %684 = vmatmul.bf16.gmra.mxu0 %v1340_v61  ;;  %724 = vmatmul.bf16.gmra.mxu2 %v1404_v62 }
  0xc1   : > { %773 = vmatmul.bf16.gmra.mxu1 %v1344_v63  ;;  %813 = vmatmul.bf16.gmra.mxu3 %v1408_v0 }
  0xd0   : > { %689 = vmatmul.bf16.gmra.mxu0 %v1348_v9  ;;  %729 = vmatmul.bf16.gmra.mxu2 %v1412_v10 }
  0xd1   : > { %778 = vmatmul.bf16.gmra.mxu1 %v1352_v11  ;;  %818 = vmatmul.bf16.gmra.mxu3 %v1416_v12  ;;  %v359_v11 = vld [vmem:[#allocation2 + $0x40] sm:$0xff] }
  0xe0   : > { %694 = vmatmul.bf16.gmra.mxu0 %v1356_v21  ;;  %734 = vmatmul.bf16.gmra.mxu2 %v1420_v22  ;;  %v360_v21 = vld [vmem:[#allocation2 + $0xc8] sm:$0xff] }
  0xe1   : > { %783 = vmatmul.bf16.gmra.mxu1 %v1360_v23  ;;  %823 = vmatmul.bf16.gmra.mxu3 %v1424_v24 }
  0xf0   : > { %699 = vmatmul.bf16.gmra.mxu0 %v1364_v33  ;;  %739 = vmatmul.bf16.gmra.mxu2 %v1428_v34 }
  0xf1   : > { %788 = vmatmul.bf16.gmra.mxu1 %v1368_v35  ;;  %828 = vmatmul.bf16.gmra.mxu3 %v1432_v36  ;;  %v346_v35 = vld [vmem:[#allocation2 + $0x68] sm:$0xff] }
 0x100   : > { %704 = vmatmul.bf16.gmra.mxu0 %v1372_v45  ;;  %744 = vmatmul.bf16.gmra.mxu2 %v1436_v46  ;;  %v347_v45 = vld [vmem:[#allocation2 + $0x30] sm:$0xff] }
 0x101   : > { %793 = vmatmul.bf16.gmra.mxu1 %v1376_v47  ;;  %833 = vmatmul.bf16.gmra.mxu3 %v1440_v48 }
 0x10d   : > { %v670_v49 = vpop.f32.mrf.mxu0 }
 0x10e   : > { %v759_v51 = vpop.f32.mrf.mxu1 }
 0x10f   : > { %v760_v52 = vadd.f32 %v759_v51, %v670_v49  ;;  %v363_v51 = vld [vmem:[#allocation2 + $0x70] sm:$0xff] }
 0x111   : > { %v839_v53 = vadd.f32 %v760_v52, %v341_v50 }
 0x113   : > { %871 = vst [vmem:[#allocation2 + $0xb0] sm:$0xff] %v839_v53  ;;  %v710_v54 = vpop.f32.mrf.mxu2 }
 0x114   : > { %v799_v56 = vpop.f32.mrf.mxu3 }
 0x115   : > { %v800_v57 = vadd.f32 %v799_v56, %v710_v54  ;;  %v672_v58 = vpop.f32.mrf.mxu0 }
 0x116   : > { %v761_v60 = vpop.f32.mrf.mxu1 }
 0x117   : > { %v855_v61 = vadd.f32 %v800_v57, %v357_v55  ;;  %v762_v62 = vadd.f32 %v761_v60, %v672_v58  ;;  %v348_v55 = vld [vmem:[#allocation2 + $0x48] sm:$0xff] }
 0x119   : > { %887 = vst [vmem:[#allocation2 + $0x38] sm:$0xff] %v855_v61  ;;  %v840_v63 = vadd.f32 %v762_v62, %v342_v59  ;;  %v364_v61 = vld [vmem:[#allocation2 + $0xc0] sm:$0xff] }
 0x11b   : > { %872 = vst [vmem:[#allocation2] sm:$0xff] %v840_v63  ;;  %v712_v0 = vpop.f32.mrf.mxu2 }
 0x11c   : > { %v801_v2 = vpop.f32.mrf.mxu3 }
 0x11d   : > { %v802_v3 = vadd.f32 %v801_v2, %v712_v0  ;;  %v675_v4 = vpop.f32.mrf.mxu0 }
 0x11e   : > { %v764_v6 = vpop.f32.mrf.mxu1 }
 0x11f   : > { %v856_v7 = vadd.f32 %v802_v3, %v358_v1  ;;  %v765_v8 = vadd.f32 %v764_v6, %v675_v4  ;;  %v349_v1 = vld [vmem:[#allocation2 + $0x80] sm:$0xff] }
 0x121   : > { %888 = vst [vmem:[#allocation2 + $0x58] sm:$0xff] %v856_v7  ;;  %v841_v9 = vadd.f32 %v765_v8, %v343_v5  ;;  %v365_v7 = vld [vmem:[#allocation2 + $0xa8] sm:$0xff] }
 0x123   : > { %873 = vst [vmem:[#allocation2 + $0xd8] sm:$0xff] %v841_v9  ;;  %v715_v10 = vpop.f32.mrf.mxu2 }
 0x124   : > { %v804_v12 = vpop.f32.mrf.mxu3 }
 0x125   : > { %v805_v13 = vadd.f32 %v804_v12, %v715_v10  ;;  %v677_v14 = vpop.f32.mrf.mxu0 }
 0x126   : > { %v766_v16 = vpop.f32.mrf.mxu1 }
 0x127   : > { %v857_v17 = vadd.f32 %v805_v13, %v359_v11  ;;  %v767_v18 = vadd.f32 %v766_v16, %v677_v14  ;;  %v350_v11 = vld [vmem:[#allocation2 + $0x88] sm:$0xff] }
 0x129   : > { %889 = vst [vmem:[#allocation2 + $0x40] sm:$0xff] %v857_v17  ;;  %v842_v19 = vadd.f32 %v767_v18, %v344_v15  ;;  %v366_v17 = vld [vmem:[#allocation2 + $0xd0] sm:$0xff] }
 0x12b   : > { %874 = vst [vmem:[#allocation2 + $0x18] sm:$0xff] %v842_v19  ;;  %v717_v20 = vpop.f32.mrf.mxu2 }
 0x12c   : > { %v806_v22 = vpop.f32.mrf.mxu3 }
 0x12d   : > { %v807_v23 = vadd.f32 %v806_v22, %v717_v20  ;;  %v680_v24 = vpop.f32.mrf.mxu0 }
 0x12e   : > { %v769_v26 = vpop.f32.mrf.mxu1 }
 0x12f   : > { %v858_v27 = vadd.f32 %v807_v23, %v360_v21  ;;  %v770_v28 = vadd.f32 %v769_v26, %v680_v24  ;;  %v351_v21 = vld [vmem:[#allocation2 + $0xe8] sm:$0xff] }
 0x131   : > { %890 = vst [vmem:[#allocation2 + $0xc8] sm:$0xff] %v858_v27  ;;  %v843_v29 = vadd.f32 %v770_v28, %v345_v25  ;;  %v367_v27 = vld [vmem:[#allocation2 + $0x10] sm:$0xff] }
 0x133   : > { %875 = vst [vmem:[#allocation2 + $0x50] sm:$0xff] %v843_v29  ;;  %v720_v30 = vpop.f32.mrf.mxu2 }
 0x134   : > { %v809_v32 = vpop.f32.mrf.mxu3 }
 0x135   : > { %v810_v33 = vadd.f32 %v809_v32, %v720_v30  ;;  %v682_v34 = vpop.f32.mrf.mxu0 }
 0x136   : > { %v771_v36 = vpop.f32.mrf.mxu1 }
 0x137   : > { %v859_v37 = vadd.f32 %v810_v33, %v361_v31  ;;  %v772_v38 = vadd.f32 %v771_v36, %v682_v34  ;;  %v352_v31 = vld [vmem:[#allocation2 + $0xb8] sm:$0xff] }
 0x139   : > { %891 = vst [vmem:[#allocation2 + $0xe0] sm:$0xff] %v859_v37  ;;  %v844_v39 = vadd.f32 %v772_v38, %v346_v35  ;;  %v368_v37 = vld [vmem:[#allocation2 + $0x28] sm:$0xff] }
 0x13b   : > { %876 = vst [vmem:[#allocation2 + $0x68] sm:$0xff] %v844_v39  ;;  %v722_v40 = vpop.f32.mrf.mxu2 }
 0x13c   : > { %v811_v42 = vpop.f32.mrf.mxu3 }
 0x13d   : > { %v812_v43 = vadd.f32 %v811_v42, %v722_v40  ;;  %v685_v44 = vpop.f32.mrf.mxu0 }
 0x13e   : > { %v774_v46 = vpop.f32.mrf.mxu1 }
 0x13f   : > { %v860_v47 = vadd.f32 %v812_v43, %v362_v41  ;;  %v775_v48 = vadd.f32 %v774_v46, %v685_v44  ;;  %v353_v41 = vld [vmem:[#allocation2 + $0x60] sm:$0xff] }
 0x141   : > { %892 = vst [vmem:[#allocation2 + $0x90] sm:$0xff] %v860_v47  ;;  %v845_v49 = vadd.f32 %v775_v48, %v347_v45  ;;  %v369_v47 = vld [vmem:[#allocation2 + $0xa0] sm:$0xff] }
 0x143   : > { %877 = vst [vmem:[#allocation2 + $0x30] sm:$0xff] %v845_v49  ;;  %v725_v50 = vpop.f32.mrf.mxu2 }
 0x144   : > { %v814_v52 = vpop.f32.mrf.mxu3 }
 0x145   : > { %v815_v53 = vadd.f32 %v814_v52, %v725_v50  ;;  %v687_v54 = vpop.f32.mrf.mxu0 }
 0x146   : > { %v776_v56 = vpop.f32.mrf.mxu1 }
 0x147   : > { %v861_v57 = vadd.f32 %v815_v53, %v363_v51  ;;  %v777_v58 = vadd.f32 %v776_v56, %v687_v54  ;;  %v354_v51 = vld [vmem:[#allocation2 + $0xf0] sm:$0xff] }
 0x149   : > { %893 = vst [vmem:[#allocation2 + $0x70] sm:$0xff] %v861_v57  ;;  %v846_v59 = vadd.f32 %v777_v58, %v348_v55  ;;  %v370_v57 = vld [vmem:[#allocation2 + $0xf8] sm:$0xff] }
 0x14b   : > { %878 = vst [vmem:[#allocation2 + $0x48] sm:$0xff] %v846_v59  ;;  %v727_v60 = vpop.f32.mrf.mxu2 }
 0x14c   : > { %v816_v62 = vpop.f32.mrf.mxu3 }
 0x14d   : > { %v817_v63 = vadd.f32 %v816_v62, %v727_v60  ;;  %v690_v0 = vpop.f32.mrf.mxu0 }
 0x14e   : > { %v779_v2 = vpop.f32.mrf.mxu1 }
 0x14f   : > { %v862_v3 = vadd.f32 %v817_v63, %v364_v61  ;;  %v780_v4 = vadd.f32 %v779_v2, %v690_v0  ;;  %v355_v61 = vld [vmem:[#allocation2 + $0x8] sm:$0xff] }
 0x151   : > { %894 = vst [vmem:[#allocation2 + $0xc0] sm:$0xff] %v862_v3  ;;  %v847_v5 = vadd.f32 %v780_v4, %v349_v1  ;;  %v371_v3 = vld [vmem:[#allocation2 + $0x20] sm:$0xff] }
 0x153   : > { %879 = vst [vmem:[#allocation2 + $0x80] sm:$0xff] %v847_v5  ;;  %v730_v6 = vpop.f32.mrf.mxu2 }
 0x154   : > { %v819_v8 = vpop.f32.mrf.mxu3 }
 0x155   : > { %v820_v9 = vadd.f32 %v819_v8, %v730_v6  ;;  %v692_v10 = vpop.f32.mrf.mxu0 }
 0x156   : > { %v781_v12 = vpop.f32.mrf.mxu1 }
 0x157   : > { %v863_v13 = vadd.f32 %v820_v9, %v365_v7  ;;  %v782_v14 = vadd.f32 %v781_v12, %v692_v10  ;;  %v356_v7 = vld [vmem:[#allocation2 + $0x78] sm:$0xff] }
 0x159   : > { %895 = vst [vmem:[#allocation2 + $0xa8] sm:$0xff] %v863_v13  ;;  %v848_v15 = vadd.f32 %v782_v14, %v350_v11  ;;  %v372_v13 = vld [vmem:[#allocation2 + $0x98] sm:$0xff] }
 0x15b   : > { %880 = vst [vmem:[#allocation2 + $0x88] sm:$0xff] %v848_v15  ;;  %v732_v16 = vpop.f32.mrf.mxu2 }
 0x15c   : > { %v821_v18 = vpop.f32.mrf.mxu3 }
 0x15d   : > { %v822_v19 = vadd.f32 %v821_v18, %v732_v16  ;;  %v695_v20 = vpop.f32.mrf.mxu0 }
 0x15e   : > { %v784_v22 = vpop.f32.mrf.mxu1 }
 0x15f   : > { %v864_v23 = vadd.f32 %v822_v19, %v366_v17  ;;  %v785_v24 = vadd.f32 %v784_v22, %v695_v20 }
 0x161   : > { %896 = vst [vmem:[#allocation2 + $0xd0] sm:$0xff] %v864_v23  ;;  %v849_v25 = vadd.f32 %v785_v24, %v351_v21 }
 0x163   : > { %881 = vst [vmem:[#allocation2 + $0xe8] sm:$0xff] %v849_v25  ;;  %v735_v26 = vpop.f32.mrf.mxu2 }
 0x164   : > { %v824_v28 = vpop.f32.mrf.mxu3 }
 0x165   : > { %v825_v29 = vadd.f32 %v824_v28, %v735_v26  ;;  %v697_v30 = vpop.f32.mrf.mxu0 }
 0x166   : > { %v786_v32 = vpop.f32.mrf.mxu1 }
 0x167   : > { %v865_v33 = vadd.f32 %v825_v29, %v367_v27  ;;  %v787_v34 = vadd.f32 %v786_v32, %v697_v30 }
 0x169   : > { %897 = vst [vmem:[#allocation2 + $0x10] sm:$0xff] %v865_v33  ;;  %v850_v35 = vadd.f32 %v787_v34, %v352_v31 }
 0x16b   : > { %882 = vst [vmem:[#allocation2 + $0xb8] sm:$0xff] %v850_v35  ;;  %v737_v36 = vpop.f32.mrf.mxu2 }
 0x16c   : > { %v826_v38 = vpop.f32.mrf.mxu3 }
 0x16d   : > { %v827_v39 = vadd.f32 %v826_v38, %v737_v36  ;;  %v700_v40 = vpop.f32.mrf.mxu0 }
 0x16e   : > { %v789_v42 = vpop.f32.mrf.mxu1 }
 0x16f   : > { %v866_v43 = vadd.f32 %v827_v39, %v368_v37  ;;  %v790_v44 = vadd.f32 %v789_v42, %v700_v40 }
 0x171   : > { %898 = vst [vmem:[#allocation2 + $0x28] sm:$0xff] %v866_v43  ;;  %v851_v45 = vadd.f32 %v790_v44, %v353_v41 }
 0x173   : > { %883 = vst [vmem:[#allocation2 + $0x60] sm:$0xff] %v851_v45  ;;  %v740_v46 = vpop.f32.mrf.mxu2 }
 0x174   : > { %v829_v48 = vpop.f32.mrf.mxu3 }
 0x175   : > { %v830_v49 = vadd.f32 %v829_v48, %v740_v46  ;;  %v702_v50 = vpop.f32.mrf.mxu0 }
 0x176   : > { %v791_v52 = vpop.f32.mrf.mxu1 }
 0x177   : > { %v867_v53 = vadd.f32 %v830_v49, %v369_v47  ;;  %v792_v54 = vadd.f32 %v791_v52, %v702_v50 }
 0x179   : > { %899 = vst [vmem:[#allocation2 + $0xa0] sm:$0xff] %v867_v53  ;;  %v852_v55 = vadd.f32 %v792_v54, %v354_v51 }
 0x17b   : > { %884 = vst [vmem:[#allocation2 + $0xf0] sm:$0xff] %v852_v55  ;;  %v742_v56 = vpop.f32.mrf.mxu2 }
 0x17c   : > { %v831_v58 = vpop.f32.mrf.mxu3 }
 0x17d   : > { %v832_v59 = vadd.f32 %v831_v58, %v742_v56  ;;  %v705_v60 = vpop.f32.mrf.mxu0 }
 0x17e   : > { %v794_v62 = vpop.f32.mrf.mxu1 }
 0x17f   : > { %v868_v63 = vadd.f32 %v832_v59, %v370_v57  ;;  %v795_v0 = vadd.f32 %v794_v62, %v705_v60 }
 0x181   : > { %900 = vst [vmem:[#allocation2 + $0xf8] sm:$0xff] %v868_v63  ;;  %v853_v1 = vadd.f32 %v795_v0, %v355_v61 }
 0x183   : > { %885 = vst [vmem:[#allocation2 + $0x8] sm:$0xff] %v853_v1  ;;  %v745_v2 = vpop.f32.mrf.mxu2 }
 0x184   : > { %v834_v4 = vpop.f32.mrf.mxu3 }
 0x185   : > { %v835_v5 = vadd.f32 %v834_v4, %v745_v2  ;;  %v707_v6 = vpop.f32.mrf.mxu0 }
 0x186   : > { %v796_v8 = vpop.f32.mrf.mxu1 }
 0x187   : > { %v869_v9 = vadd.f32 %v835_v5, %v371_v3  ;;  %v797_v10 = vadd.f32 %v796_v8, %v707_v6 }
 0x189   : > { %901 = vst [vmem:[#allocation2 + $0x20] sm:$0xff] %v869_v9  ;;  %v854_v11 = vadd.f32 %v797_v10, %v356_v7 }
 0x18b   : > { %886 = vst [vmem:[#allocation2 + $0x78] sm:$0xff] %v854_v11  ;;  %v747_v12 = vpop.f32.mrf.mxu2 }
 0x18c   : > { %v836_v14 = vpop.f32.mrf.mxu3 }
 0x18d   : > { %v837_v15 = vadd.f32 %v836_v14, %v747_v12 }
 0x18f   : > { %v870_v16 = vadd.f32 %v837_v15, %v372_v13 }
 0x191   : > { %902 = vst [vmem:[#allocation2 + $0x98] sm:$0xff] %v870_v16 }
 0x192 PF: > { %p1505_p11 = scmp.ne.s32.totalorder %s1971_s25, 1 }
 0x194   : > { %906 = sbr.rel (%p1505_p11) target bundleno = 643 (0x283), region = 52 }
 0x199   : > { %v1596_v17 = vld [vmem:[%s2340_s3 + $0x38] sm:$0xff]  ;;  %v1595_v18 = vld [vmem:[%s2340_s3 + $0x30] sm:$0xff]  ;;  %v1594_v19 = vld [vmem:[%s2340_s3 + $0x28] sm:$0xff] }
 0x19a   : > { %1023 = vmatpush.bf16.msra.mxu0 %v1596_v17  ;;  %1708 = vmatpush.bf16.msra.mxu1 %v1596_v17  ;;  %v1593_v20 = vld [vmem:[%s2340_s3 + $0x20] sm:$0xff]  ;;  %v1592_v21 = vld [vmem:[%s2340_s3 + $0x18] sm:$0xff]  ;;  %v1591_v22 = vld [vmem:[%s2340_s3 + $0x10] sm:$0xff] }
 0x19b   : > { %1709 = vmatpush.bf16.msra.mxu2 %v1596_v17  ;;  %1710 = vmatpush.bf16.msra.mxu3 %v1596_v17  ;;  %v1590_v23 = vld [vmem:[%s2340_s3 + $0x8] sm:$0xff]  ;;  %v1589_v24 = vld [vmem:[%s2340_s3] sm:$0xff]  ;;  %v907_v25 = vld [vmem:[#allocation2 + $0xb0] sm:$0xff] }
 0x19c   : > { %v908_v26 = vld [vmem:[#allocation2] sm:$0xff]  ;;  %v916_v28 = vld [vmem:[#allocation2 + $0x88] sm:$0xff]  ;;  %v923_v29 = vld [vmem:[#allocation2 + $0x38] sm:$0xff] }
 0x19d   : > { %v915_v27 = vld [vmem:[#allocation2 + $0x80] sm:$0xff]  ;;  %v924_v30 = vld [vmem:[#allocation2 + $0x58] sm:$0xff]  ;;  %v931_v31 = vld [vmem:[#allocation2 + $0xa8] sm:$0xff]  ;;  %v939_v33 = vpack.c.bf16 %v908_v26, %v907_v25 }
 0x19e   : > { %1024 = vmatpush.bf16.msra.mxu0 %v1595_v18  ;;  %1711 = vmatpush.bf16.msra.mxu1 %v1595_v18  ;;  %v932_v32 = vld [vmem:[#allocation2 + $0xd0] sm:$0xff]  ;;  %v943_v34 = vpack.c.bf16 %v916_v28, %v915_v27  ;;  %v947_v35 = vpack.c.bf16 %v924_v30, %v923_v29  ;;  %v909_v37 = vld [vmem:[#allocation2 + $0xd8] sm:$0xff]  ;;  %v917_v39 = vld [vmem:[#allocation2 + $0xe8] sm:$0xff] }
 0x19f   : > { %1712 = vmatpush.bf16.msra.mxu2 %v1595_v18  ;;  %1713 = vmatpush.bf16.msra.mxu3 %v1595_v18  ;;  %v951_v36 = vpack.c.bf16 %v932_v32, %v931_v31  ;;  %v910_v38 = vld [vmem:[#allocation2 + $0x18] sm:$0xff]  ;;  %v925_v41 = vld [vmem:[#allocation2 + $0x40] sm:$0xff]  ;;  %v926_v42 = vld [vmem:[#allocation2 + $0xc8] sm:$0xff] }
 0x1a0   : > { %v918_v40 = vld [vmem:[#allocation2 + $0xb8] sm:$0xff]  ;;  %v933_v43 = vld [vmem:[#allocation2 + $0x10] sm:$0xff]  ;;  %v934_v44 = vld [vmem:[#allocation2 + $0x28] sm:$0xff]  ;;  %v940_v45 = vpack.c.bf16 %v910_v38, %v909_v37  ;;  %v948_v47 = vpack.c.bf16 %v926_v42, %v925_v41 }
 0x1a1   : > { %v944_v46 = vpack.c.bf16 %v918_v40, %v917_v39  ;;  %v952_v48 = vpack.c.bf16 %v934_v44, %v933_v43  ;;  %v911_v49 = vld [vmem:[#allocation2 + $0x50] sm:$0xff]  ;;  %v912_v50 = vld [vmem:[#allocation2 + $0x68] sm:$0xff]  ;;  %v919_v51 = vld [vmem:[#allocation2 + $0x60] sm:$0xff] }
 0x1a2   : > { %1025 = vmatpush.bf16.msra.mxu0 %v1594_v19  ;;  %1714 = vmatpush.bf16.msra.mxu1 %v1594_v19  ;;  %v920_v52 = vld [vmem:[#allocation2 + $0xf0] sm:$0xff]  ;;  %v927_v53 = vld [vmem:[#allocation2 + $0xe0] sm:$0xff]  ;;  %v936_v56 = vld [vmem:[#allocation2 + $0xf8] sm:$0xff]  ;;  %v941_v57 = vpack.c.bf16 %v912_v50, %v911_v49 }
 0x1a3   : > { %1715 = vmatpush.bf16.msra.mxu2 %v1594_v19  ;;  %1716 = vmatpush.bf16.msra.mxu3 %v1594_v19  ;;  %v928_v54 = vld [vmem:[#allocation2 + $0x90] sm:$0xff]  ;;  %v935_v55 = vld [vmem:[#allocation2 + $0xa0] sm:$0xff]  ;;  %v945_v58 = vpack.c.bf16 %v920_v52, %v919_v51  ;;  %v914_v62 = vld [vmem:[#allocation2 + $0x48] sm:$0xff] }
 0x1a4   : > { %v949_v59 = vpack.c.bf16 %v928_v54, %v927_v53  ;;  %v953_v60 = vpack.c.bf16 %v936_v56, %v935_v55  ;;  %v913_v61 = vld [vmem:[#allocation2 + $0x30] sm:$0xff]  ;;  %v921_v63 = vld [vmem:[#allocation2 + $0x8] sm:$0xff]  ;;  %v922_v0 = vld [vmem:[#allocation2 + $0x78] sm:$0xff] }
 0x1a5   : > { %v929_v1 = vld [vmem:[#allocation2 + $0x70] sm:$0xff]  ;;  %v930_v2 = vld [vmem:[#allocation2 + $0xc0] sm:$0xff]  ;;  %v938_v4 = vld [vmem:[#allocation2 + $0x98] sm:$0xff]  ;;  %v942_v5 = vpack.c.bf16 %v914_v62, %v913_v61  ;;  %v946_v6 = vpack.c.bf16 %v922_v0, %v921_v63 }
 0x1a6   : > { %1026 = vmatpush.bf16.msra.mxu0 %v1593_v20  ;;  %1717 = vmatpush.bf16.msra.mxu1 %v1593_v20  ;;  %v937_v3 = vld [vmem:[#allocation2 + $0x20] sm:$0xff]  ;;  %v950_v7 = vpack.c.bf16 %v930_v2, %v929_v1 }
 0x1a7   : > { %1718 = vmatpush.bf16.msra.mxu2 %v1593_v20  ;;  %1719 = vmatpush.bf16.msra.mxu3 %v1593_v20  ;;  %v954_v8 = vpack.c.bf16 %v938_v4, %v937_v3  ;;  %v2263_v11 = vld [vmem:[%s2341_s4] ss:$0 sm:$0xff] }
 0x1aa   : > { %1027 = vmatpush.bf16.msra.mxu0 %v1592_v21  ;;  %1720 = vmatpush.bf16.msra.mxu1 %v1592_v21 }
 0x1ab   : > { %1721 = vmatpush.bf16.msra.mxu2 %v1592_v21  ;;  %1722 = vmatpush.bf16.msra.mxu3 %v1592_v21 }
 0x1ae   : > { %1028 = vmatpush.bf16.msra.mxu0 %v1591_v22  ;;  %1723 = vmatpush.bf16.msra.mxu1 %v1591_v22 }
 0x1af   : > { %1724 = vmatpush.bf16.msra.mxu2 %v1591_v22  ;;  %1725 = vmatpush.bf16.msra.mxu3 %v1591_v22 }
 0x1b2   : > { %1029 = vmatpush.bf16.msra.mxu0 %v1590_v23  ;;  %1726 = vmatpush.bf16.msra.mxu1 %v1590_v23 }
 0x1b3   : > { %1727 = vmatpush.bf16.msra.mxu2 %v1590_v23  ;;  %1728 = vmatpush.bf16.msra.mxu3 %v1590_v23 }
 0x1b6   : > { %1030 = vmatpush.bf16.msra.mxu0 %v1589_v24  ;;  %1729 = vmatpush.bf16.msra.mxu1 %v1589_v24 }
 0x1b7   : > { %1730 = vmatpush.bf16.msra.mxu2 %v1589_v24  ;;  %1731 = vmatpush.bf16.msra.mxu3 %v1589_v24 }
 0x1b9   : > { %1031 = vmatmul.bf16.vlgmr.msra.gmra.mxu0 %v939_v33  ;;  %1051 = vmatmul.bf16.vlgmr.msra.gmra.mxu1 %v943_v34 }
 0x1ba   : > { %1071 = vmatmul.bf16.vlgmr.msra.gmra.mxu2 %v947_v35  ;;  %1091 = vmatmul.bf16.vlgmr.msra.gmra.mxu3 %v951_v36 }
 0x1c9   : > { %1036 = vmatmul.bf16.gmra.mxu0 %v940_v45  ;;  %1056 = vmatmul.bf16.gmra.mxu1 %v944_v46 }
 0x1ca   : > { %1076 = vmatmul.bf16.gmra.mxu2 %v948_v47  ;;  %1096 = vmatmul.bf16.gmra.mxu3 %v952_v48 }
 0x1d9   : > { %1041 = vmatmul.bf16.gmra.mxu0 %v941_v57  ;;  %1061 = vmatmul.bf16.gmra.mxu1 %v945_v58 }
 0x1da   : > { %1081 = vmatmul.bf16.gmra.mxu2 %v949_v59  ;;  %1101 = vmatmul.bf16.gmra.mxu3 %v953_v60 }
 0x1e9   : > { %1046 = vmatmul.bf16.gmra.mxu0 %v942_v5  ;;  %1066 = vmatmul.bf16.gmra.mxu1 %v946_v6 }
 0x1ea   : > { %1086 = vmatmul.bf16.gmra.mxu2 %v950_v7  ;;  %1106 = vmatmul.bf16.gmra.mxu3 %v954_v8 }
 0x236   : > { %v1032_v9 = vpop.f32.mrf.mxu0  ;;  %v1052_v10 = vpop.f32.mrf.mxu1 }
 0x237   : > { %v1033_v12 = vadd.f32 %v2263_v11, %v1032_v9  ;;  %v1053_v13 = vadd.f32 %v2263_v11, %v1052_v10 }
 0x239   : > { %1813 = vtanh.f32 %v1033_v12 }
 0x23a   : > { %1815 = vtanh.f32 %v1053_v13 }
 0x23d   : > { %v1072_v14 = vpop.f32.mrf.mxu2  ;;  %v1092_v15 = vpop.f32.mrf.mxu3 }
 0x23e   : > { %v1034_v16 = vpop.f32.mrf.mxu0  ;;  %v1054_v17 = vpop.f32.mrf.mxu1  ;;  %v1073_v20 = vadd.f32 %v2263_v11, %v1072_v14  ;;  %v1093_v21 = vadd.f32 %v2263_v11, %v1092_v15 }
 0x23f   : > { %v1035_v18 = vadd.f32 %v2263_v11, %v1034_v16  ;;  %v1055_v19 = vadd.f32 %v2263_v11, %v1054_v17  ;;  %v1814_v24 = vpop.eup %1813 }
 0x240   : > { %v1816_v29 = vpop.eup %1815 }
 0x241   : > { %1817 = vtanh.f32 %v1035_v18 }
 0x242   : > { %1819 = vtanh.f32 %v1055_v19 }
 0x243   : > { %1821 = vtanh.f32 %v1073_v20 }
 0x244   : > { %1823 = vtanh.f32 %v1093_v21 }
 0x245   : > { %v1074_v22 = vpop.f32.mrf.mxu2  ;;  %v1094_v23 = vpop.f32.mrf.mxu3 }
 0x246   : > { %v1075_v25 = vadd.f32 %v2263_v11, %v1074_v22  ;;  %v1095_v26 = vadd.f32 %v2263_v11, %v1094_v23  ;;  %v1037_v27 = vpop.f32.mrf.mxu0  ;;  %v1057_v28 = vpop.f32.mrf.mxu1 }
 0x247   : > { %v1818_v30 = vpop.eup %1817  ;;  %v1038_v35 = vadd.f32 %v2263_v11, %v1037_v27  ;;  %v1058_v37 = vadd.f32 %v2263_v11, %v1057_v28 }
 0x248   : > { %1825 = vtanh.f32 %v1075_v25  ;;  %v1820_v31 = vpop.eup %1819  ;;  %v1600_v32 = vpack.c.bf16 %v1818_v30, %v1814_v24 }
 0x249   : > { %1827 = vtanh.f32 %v1095_v26  ;;  %v1620_v33 = vpack.c.bf16 %v1820_v31, %v1816_v29  ;;  %v1822_v34 = vpop.eup %1821 }
 0x24a   : > { %1601 = vst [vmem:[%s2143_s17] sm:$0xff] %v1600_v32   ;;  %v1824_v36 = vpop.eup %1823  ;;  %1829 = vtanh.f32 %v1038_v35 }
 0x24b   : > { %1680 = vst [vmem:[%s2143_s17 + $0x20] sm:$0xff] %v1620_v33   ;;  %1831 = vtanh.f32 %v1058_v37 }
 0x24d   : > { %v1077_v38 = vpop.f32.mrf.mxu2  ;;  %v1097_v39 = vpop.f32.mrf.mxu3 }
 0x24e   : > { %v1826_v40 = vpop.eup %1825  ;;  %v1039_v41 = vpop.f32.mrf.mxu0  ;;  %v1078_v48 = vadd.f32 %v2263_v11, %v1077_v38  ;;  %v1098_v49 = vadd.f32 %v2263_v11, %v1097_v39 }
 0x24f   : > { %v1059_v42 = vpop.f32.mrf.mxu1  ;;  %v1828_v43 = vpop.eup %1827  ;;  %v1640_v44 = vpack.c.bf16 %v1826_v40, %v1822_v34  ;;  %v1040_v45 = vadd.f32 %v2263_v11, %v1039_v41 }
 0x250   : > { %v1060_v46 = vadd.f32 %v2263_v11, %v1059_v42  ;;  %v1660_v47 = vpack.c.bf16 %v1828_v43, %v1824_v36  ;;  %v1830_v52 = vpop.eup %1829 }
 0x251   : > { %1684 = vst [vmem:[%s2143_s17 + $0x40] sm:$0xff] %v1640_v44   ;;  %1833 = vtanh.f32 %v1040_v45  ;;  %v1832_v57 = vpop.eup %1831 }
 0x252   : > { %1688 = vst [vmem:[%s2143_s17 + $0x60] sm:$0xff] %v1660_v47   ;;  %1835 = vtanh.f32 %v1060_v46 }
 0x253   : > { %1837 = vtanh.f32 %v1078_v48 }
 0x254   : > { %1839 = vtanh.f32 %v1098_v49 }
 0x255   : > { %v1079_v50 = vpop.f32.mrf.mxu2  ;;  %v1099_v51 = vpop.f32.mrf.mxu3 }
 0x256   : > { %v1080_v53 = vadd.f32 %v2263_v11, %v1079_v50  ;;  %v1100_v54 = vadd.f32 %v2263_v11, %v1099_v51  ;;  %v1042_v55 = vpop.f32.mrf.mxu0 }
 0x257   : > { %v1062_v56 = vpop.f32.mrf.mxu1  ;;  %v1834_v58 = vpop.eup %1833  ;;  %v1043_v63 = vadd.f32 %v2263_v11, %v1042_v55 }
 0x258   : > { %1841 = vtanh.f32 %v1080_v53  ;;  %v1836_v59 = vpop.eup %1835  ;;  %v1605_v60 = vpack.c.bf16 %v1834_v58, %v1830_v52  ;;  %v1063_v1 = vadd.f32 %v2263_v11, %v1062_v56 }
 0x259   : > { %1843 = vtanh.f32 %v1100_v54  ;;  %v1625_v61 = vpack.c.bf16 %v1836_v59, %v1832_v57  ;;  %v1838_v62 = vpop.eup %1837 }
 0x25a   : > { %1677 = vst [vmem:[%s2143_s17 + $0x8] sm:$0xff] %v1605_v60   ;;  %v1840_v0 = vpop.eup %1839  ;;  %1845 = vtanh.f32 %v1043_v63 }
 0x25b   : > { %1681 = vst [vmem:[%s2143_s17 + $0x28] sm:$0xff] %v1625_v61   ;;  %1847 = vtanh.f32 %v1063_v1 }
 0x25d   : > { %v1082_v2 = vpop.f32.mrf.mxu2  ;;  %v1102_v3 = vpop.f32.mrf.mxu3 }
 0x25e   : > { %v1842_v4 = vpop.eup %1841  ;;  %v1044_v5 = vpop.f32.mrf.mxu0  ;;  %v1083_v13 = vadd.f32 %v2263_v11, %v1082_v2  ;;  %v1103_v14 = vadd.f32 %v2263_v11, %v1102_v3 }
 0x25f   : > { %v1064_v6 = vpop.f32.mrf.mxu1  ;;  %v1844_v7 = vpop.eup %1843  ;;  %v1645_v8 = vpack.c.bf16 %v1842_v4, %v1838_v62  ;;  %v1045_v9 = vadd.f32 %v2263_v11, %v1044_v5 }
 0x260   : > { %v1065_v10 = vadd.f32 %v2263_v11, %v1064_v6  ;;  %v1665_v12 = vpack.c.bf16 %v1844_v7, %v1840_v0  ;;  %v1846_v17 = vpop.eup %1845 }
 0x261   : > { %1685 = vst [vmem:[%s2143_s17 + $0x48] sm:$0xff] %v1645_v8   ;;  %1849 = vtanh.f32 %v1045_v9  ;;  %v1848_v22 = vpop.eup %1847 }
 0x262   : > { %1689 = vst [vmem:[%s2143_s17 + $0x68] sm:$0xff] %v1665_v12   ;;  %1851 = vtanh.f32 %v1065_v10 }
 0x263   : > { %1853 = vtanh.f32 %v1083_v13 }
 0x264   : > { %1855 = vtanh.f32 %v1103_v14 }
 0x265   : > { %v1084_v15 = vpop.f32.mrf.mxu2  ;;  %v1104_v16 = vpop.f32.mrf.mxu3 }
 0x266   : > { %v1085_v18 = vadd.f32 %v2263_v11, %v1084_v15  ;;  %v1105_v19 = vadd.f32 %v2263_v11, %v1104_v16  ;;  %v1047_v20 = vpop.f32.mrf.mxu0 }
 0x267   : > { %v1067_v21 = vpop.f32.mrf.mxu1  ;;  %v1850_v23 = vpop.eup %1849  ;;  %v1048_v28 = vadd.f32 %v2263_v11, %v1047_v20 }
 0x268   : > { %1857 = vtanh.f32 %v1085_v18  ;;  %v1852_v24 = vpop.eup %1851  ;;  %v1610_v25 = vpack.c.bf16 %v1850_v23, %v1846_v17  ;;  %v1068_v30 = vadd.f32 %v2263_v11, %v1067_v21 }
 0x269   : > { %1859 = vtanh.f32 %v1105_v19  ;;  %v1630_v26 = vpack.c.bf16 %v1852_v24, %v1848_v22  ;;  %v1854_v27 = vpop.eup %1853 }
 0x26a   : > { %1678 = vst [vmem:[%s2143_s17 + $0x10] sm:$0xff] %v1610_v25   ;;  %v1856_v29 = vpop.eup %1855  ;;  %1861 = vtanh.f32 %v1048_v28 }
 0x26b   : > { %1682 = vst [vmem:[%s2143_s17 + $0x30] sm:$0xff] %v1630_v26   ;;  %1863 = vtanh.f32 %v1068_v30 }
 0x26d   : > { %v1087_v31 = vpop.f32.mrf.mxu2  ;;  %v1107_v32 = vpop.f32.mrf.mxu3 }
 0x26e   : > { %v1858_v33 = vpop.eup %1857  ;;  %v1049_v34 = vpop.f32.mrf.mxu0  ;;  %v1088_v41 = vadd.f32 %v2263_v11, %v1087_v31  ;;  %v1108_v42 = vadd.f32 %v2263_v11, %v1107_v32 }
 0x26f   : > { %v1069_v35 = vpop.f32.mrf.mxu1  ;;  %v1860_v36 = vpop.eup %1859  ;;  %v1650_v37 = vpack.c.bf16 %v1858_v33, %v1854_v27  ;;  %v1050_v38 = vadd.f32 %v2263_v11, %v1049_v34 }
 0x270   : > { %v1070_v39 = vadd.f32 %v2263_v11, %v1069_v35  ;;  %v1670_v40 = vpack.c.bf16 %v1860_v36, %v1856_v29  ;;  %v1862_v45 = vpop.eup %1861 }
 0x271   : > { %1686 = vst [vmem:[%s2143_s17 + $0x50] sm:$0xff] %v1650_v37   ;;  %1865 = vtanh.f32 %v1050_v38  ;;  %v1864_v48 = vpop.eup %1863 }
 0x272   : > { %1690 = vst [vmem:[%s2143_s17 + $0x70] sm:$0xff] %v1670_v40   ;;  %1867 = vtanh.f32 %v1070_v39 }
 0x273   : > { %1869 = vtanh.f32 %v1088_v41 }
 0x274   : > { %1871 = vtanh.f32 %v1108_v42 }
 0x275   : > { %v1089_v43 = vpop.f32.mrf.mxu2  ;;  %v1109_v44 = vpop.f32.mrf.mxu3 }
 0x276   : > { %v1090_v46 = vadd.f32 %v2263_v11, %v1089_v43  ;;  %v1110_v47 = vadd.f32 %v2263_v11, %v1109_v44 }
 0x277   : > { %v1866_v49 = vpop.eup %1865 }
 0x278   : > { %1873 = vtanh.f32 %v1090_v46  ;;  %v1868_v50 = vpop.eup %1867  ;;  %v1615_v51 = vpack.c.bf16 %v1866_v49, %v1862_v45 }
 0x279   : > { %1875 = vtanh.f32 %v1110_v47  ;;  %v1635_v52 = vpack.c.bf16 %v1868_v50, %v1864_v48  ;;  %v1870_v53 = vpop.eup %1869 }
 0x27a   : > { %1679 = vst [vmem:[%s2143_s17 + $0x18] sm:$0xff] %v1615_v51   ;;  %v1872_v54 = vpop.eup %1871 }
 0x27b   : > { %1683 = vst [vmem:[%s2143_s17 + $0x38] sm:$0xff] %v1635_v52  }
 0x27e   : > { %v1874_v55 = vpop.eup %1873 }
 0x27f   : > { %v1876_v56 = vpop.eup %1875  ;;  %v1655_v57 = vpack.c.bf16 %v1874_v55, %v1870_v53 }
 0x280   : > { %v1675_v58 = vpack.c.bf16 %v1876_v56, %v1872_v54 }
 0x281   : > { %1687 = vst [vmem:[%s2143_s17 + $0x58] sm:$0xff] %v1655_v57  }
 0x282   : > { %1691 = vst [vmem:[%s2143_s17 + $0x78] sm:$0xff] %v1675_v58  }
 0x283 PF: > { %s26_s28 = sadd.s32 1, %s1987_s28   ;;  %s2351_s19 = sld [smem:[#allocation11_spill]] }
 0x284   : > { %p23_p12 = scmp.ge.s32.totalorder %s26_s28, 6   ;;  %s2352_s29 = sld [smem:[#allocation12_spill]] }
 0x285   : > { %s2353_s22 = smov %s1963_s23  ;;  %s2354_s23 = smov %s1967_s24 }
 0x286   : > { %s2355_s24 = smov %s2105_s6  ;;  %s2356_s25 = smov %s1979_s27 }
 0x287   : > { %s2357_s26 = smov %s1983_s0  ;;  %25 = sbr.rel (!%p23_p12) target bundleno = 11 (0xb), region = 89 }
 0x289   : > { %s2358_s27 = smov %s2351_s19 }
 0x28a   : > { %s2359_s0 = smov %s2352_s29 }
 0x28c   :  { %1230 = vsyncpa [#allocation6], 1 }
 0x28d   :  { %1232 = vsyncpa [#allocation6 + $0x1], 1 }

</bundles_post_ra>
